<compile_context>
chip_gen: v7x
topology: tpu7x:2x2x1
jax: 0.10.0
libtpu: 0.0.40
codegen_flags: <defaults>
</compile_context>

<pallas_src>
import functools
import math

import jax
import jax.numpy as jnp
import numpy as np
from jax import lax
from jax.experimental import pallas as pl
from jax.experimental.pallas import tpu as pltpu


def _r8(n):
    return ((n + 7) // 8) * 8


# --------------------------------------------------------------------------- layouts

def _edge_layout(K, P, D, ps):
    """Row offsets (8-aligned) of the 'edge' slab: patch-embed + linear_mapping."""
    o = {}
    o["pe_w"] = 0
    o["pos"] = _r8(o["pe_w"] + K)
    o["pe_b"] = _r8(o["pos"] + P)
    o["map_w1"] = _r8(o["pe_b"] + 1)
    o["map_b1"] = _r8(o["map_w1"] + D)
    o["map_w2"] = _r8(o["map_b1"] + 1)
    o["map_b2"] = _r8(o["map_w2"] + ps)
    o["rows"] = _r8(o["map_b2"] + 1)
    return o


# Row indices inside the per-layer vector slab.
_V_BQKV, _V_SA_BO, _V_CA_BQ, _V_CA_BKV, _V_CA_BO, _V_FF_B1, _V_FF_B2 = range(7)
_V_N1G, _V_N1B, _V_N2G, _V_N2B, _V_N3G, _V_N3B = range(7, 13)
_V_ROWS = _r8(13)


def pack_params(params, cfg):
    """One-time packing of all weights into the slabs the kernels consume."""
    D, ff, ps, dv = cfg["embed_dim"], cfg["dim_ff"], cfg["patch_size"], cfg["dim_val"]
    K = ps * ps
    P = cfg["num_patches"]
    wcol = max(3 * D, ff)
    f32 = jnp.float32

    # decoder_input_layer slab: row0=w1, row1=b1, row2=b2, rows[8:8+dv]=w2
    din = jnp.zeros((_r8(8 + dv), dv), f32)
    din = din.at[0:1, :].set(params["dec_in_w1"])
    din = din.at[1, :].set(params["dec_in_b1"])
    din = din.at[2, :].set(params["dec_in_b2"])
    din = din.at[8:8 + dv, :].set(params["dec_in_w2"])

    # edge slab: patch-embed proj/pos + linear_mapping
    eo = _edge_layout(K, P, D, ps)
    edge = jnp.zeros((eo["rows"], D), f32)
    edge = edge.at[eo["pe_w"]:eo["pe_w"] + K, :].set(params["pat_emd"]["proj_w"])
    edge = edge.at[eo["pos"]:eo["pos"] + P, :].set(params["pat_emd"]["pos_embed"][0, 1:, :])
    edge = edge.at[eo["pe_b"], :].set(params["pat_emd"]["proj_b"])
    edge = edge.at[eo["map_w1"]:eo["map_w1"] + D, :ps].set(params["map_w1"])
    edge = edge.at[eo["map_b1"], :ps].set(params["map_b1"])
    edge = edge.at[eo["map_w2"]:eo["map_w2"] + ps, :ps].set(params["map_w2"])
    edge = edge.at[eo["map_b2"], :ps].set(params["map_b2"])

    # per-layer slabs, stacked with a leading layer axis
    wds, vecs = [], []
    for lp in params["layers"]:
        sa, ca = lp["self_attn"], lp["cross_attn"]
        wd = jnp.zeros((6 * D + ff, wcol), f32)
        wd = wd.at[0:D, 0:D].set(sa["w_q"])            # fused QKV  (rows 0:D)
        wd = wd.at[0:D, D:2 * D].set(sa["w_k"])
        wd = wd.at[0:D, 2 * D:3 * D].set(sa["w_v"])
        wd = wd.at[D:2 * D, 0:D].set(sa["w_o"])        # self out-proj
        wd = wd.at[2 * D:3 * D, 0:D].set(ca["w_q"])    # cross Q
        wd = wd.at[3 * D:4 * D, 0:D].set(ca["w_k"])    # fused cross KV
        wd = wd.at[3 * D:4 * D, D:2 * D].set(ca["w_v"])
        wd = wd.at[4 * D:5 * D, 0:D].set(ca["w_o"])    # cross out-proj
        wd = wd.at[5 * D:6 * D, 0:ff].set(lp["ff_w1"])
        wd = wd.at[6 * D:6 * D + ff, 0:D].set(lp["ff_w2"])

        vec = jnp.zeros((_V_ROWS, wcol), f32)
        vec = vec.at[_V_BQKV, 0:D].set(sa["b_q"])
        vec = vec.at[_V_BQKV, D:2 * D].set(sa["b_k"])
        vec = vec.at[_V_BQKV, 2 * D:3 * D].set(sa["b_v"])
        vec = vec.at[_V_SA_BO, 0:D].set(sa["b_o"])
        vec = vec.at[_V_CA_BQ, 0:D].set(ca["b_q"])
        vec = vec.at[_V_CA_BKV, 0:D].set(ca["b_k"])
        vec = vec.at[_V_CA_BKV, D:2 * D].set(ca["b_v"])
        vec = vec.at[_V_CA_BO, 0:D].set(ca["b_o"])
        vec = vec.at[_V_FF_B1, 0:ff].set(lp["ff_b1"])
        vec = vec.at[_V_FF_B2, 0:D].set(lp["ff_b2"])
        vec = vec.at[_V_N1G, 0:D].set(lp["norm1_g"])
        vec = vec.at[_V_N1B, 0:D].set(lp["norm1_b"])
        vec = vec.at[_V_N2G, 0:D].set(lp["norm2_g"])
        vec = vec.at[_V_N2B, 0:D].set(lp["norm2_b"])
        vec = vec.at[_V_N3G, 0:D].set(lp["norm3_g"])
        vec = vec.at[_V_N3B, 0:D].set(lp["norm3_b"])
        wds.append(wd)
        vecs.append(vec)

    return {"din": din, "edge": edge,
            "wd": jnp.stack(wds), "vec": jnp.stack(vecs)}


# --------------------------------------------------------------------------- kernel A

def _dec_input_kernel(t_ref, p_ref, o_ref, *, dv):
    t = t_ref[...]                                   # (M, 1)
    w1 = p_ref[0:1, :]                               # (1, dv)
    b1 = p_ref[1:2, :]
    b2 = p_ref[2:3, :]
    w2 = p_ref[8:8 + dv, :]                          # (dv, dv)
    h = jnp.tanh(t * w1 + b1)                        # K=1 linear as a VPU broadcast FMA
    o_ref[...] = (jnp.dot(h, w2, preferred_element_type=jnp.float32) + b2
                  ).astype(o_ref.dtype)


def decoder_input(tgt, din, dv):
    B, S, _ = tgt.shape
    M = B * S
    t = tgt.reshape(M, 1)
    kernel = functools.partial(_dec_input_kernel, dv=dv)
    return pl.pallas_call(
        kernel,
        out_shape=jax.ShapeDtypeStruct((M, dv), jnp.float32),
        grid=(1,),
        in_specs=[pl.BlockSpec((M, 1), lambda i: (0, 0)),
                  pl.BlockSpec(din.shape, lambda i: (0, 0))],
        out_specs=pl.BlockSpec((M, dv), lambda i: (0, 0)),
    )(t, din)


# --------------------------------------------------------------------------- kernel B

def _vit_decoder_stack_kernel(
        patches_ref, mem_ref, smask_ref, cmask_ref, edge_ref, wd_ref, vec_ref,
        o_ref, x_buf,
        *, n_heads, d_model, d_ff, patch_size, n_patches, n_batch, eps):
    D, ff, ps, P = d_model, d_ff, patch_size, n_patches
    K = ps * ps
    hd = D // n_heads
    scale = 1.0 / math.sqrt(hd)
    layer = pl.program_id(0)
    eo = _edge_layout(K, P, D, ps)

    def layer_norm(y, g, b):
        m = jnp.mean(y, axis=-1, keepdims=True)
        c = y - m
        v = jnp.mean(c * c, axis=-1, keepdims=True)
        return c * lax.rsqrt(v + eps) * g + b

    def attend(q, k, v, bias):
        # All heads in one pass; head outputs concatenated in registers so the
        # downstream out-projection sees a single lane-dense (M, D) operand
        # (no masked stripe stores into a VMEM scratch).
        outs = []
        for h in range(n_heads):
            qh = q[:, h * hd:(h + 1) * hd]
            kh = k[:, h * hd:(h + 1) * hd]
            vh = v[:, h * hd:(h + 1) * hd]
            s = lax.dot_general(qh, kh, (((1,), (1,)), ((), ())),
                                preferred_element_type=jnp.float32) * scale
            s = s + bias                          # causal + batch block-diag mask
            s = s - jnp.max(s, axis=-1, keepdims=True)
            p = jnp.exp(s)
            p = p * pl.reciprocal(jnp.sum(p, axis=-1, keepdims=True), approx=True)
            outs.append(jnp.dot(p, vh, preferred_element_type=jnp.float32))
        return jnp.concatenate(outs, axis=-1)     # (M, D)

    # ---- prologue (grid step 0): patch-embed projection + positional embedding
    @pl.when(layer == 0)
    def _():
        pe_w = edge_ref[eo["pe_w"]:eo["pe_w"] + K, 0:D]
        pe_b = edge_ref[eo["pe_b"]:eo["pe_b"] + 1, 0:D]
        pos = edge_ref[eo["pos"]:eo["pos"] + P, 0:D]
        y = jnp.dot(patches_ref[...], pe_w, preferred_element_type=jnp.float32) + pe_b
        pos_t = jnp.concatenate([pos] * n_batch, axis=0)         # (B*P, D)
        x_buf[...] = y + pos_t

    # ---- one nn.TransformerDecoderLayer per grid step (batch folded into M)
    x = x_buf[...]                                               # (B*P, D)

    # self-attention with fused QKV projection
    qkv = (jnp.dot(x, wd_ref[0:D, 0:3 * D], preferred_element_type=jnp.float32)
           + vec_ref[_V_BQKV:_V_BQKV + 1, 0:3 * D])
    a = attend(qkv[:, 0:D], qkv[:, D:2 * D], qkv[:, 2 * D:3 * D], smask_ref[...])
    sa = (jnp.dot(a, wd_ref[D:2 * D, 0:D], preferred_element_type=jnp.float32)
          + vec_ref[_V_SA_BO:_V_SA_BO + 1, 0:D])
    x = layer_norm(x + sa, vec_ref[_V_N1G:_V_N1G + 1, 0:D],
                   vec_ref[_V_N1B:_V_N1B + 1, 0:D])

    # cross-attention with fused KV projection on the memory
    q = (jnp.dot(x, wd_ref[2 * D:3 * D, 0:D], preferred_element_type=jnp.float32)
         + vec_ref[_V_CA_BQ:_V_CA_BQ + 1, 0:D])
    kv = (jnp.dot(mem_ref[...], wd_ref[3 * D:4 * D, 0:2 * D],
                  preferred_element_type=jnp.float32)
          + vec_ref[_V_CA_BKV:_V_CA_BKV + 1, 0:2 * D])
    a = attend(q, kv[:, 0:D], kv[:, D:2 * D], cmask_ref[...])
    ca = (jnp.dot(a, wd_ref[4 * D:5 * D, 0:D], preferred_element_type=jnp.float32)
          + vec_ref[_V_CA_BO:_V_CA_BO + 1, 0:D])
    x = layer_norm(x + ca, vec_ref[_V_N2G:_V_N2G + 1, 0:D],
                   vec_ref[_V_N2B:_V_N2B + 1, 0:D])

    # feed-forward (relu)
    h1 = jnp.maximum(
        jnp.dot(x, wd_ref[5 * D:6 * D, 0:ff], preferred_element_type=jnp.float32)
        + vec_ref[_V_FF_B1:_V_FF_B1 + 1, 0:ff], 0.0)
    h2 = (jnp.dot(h1, wd_ref[6 * D:6 * D + ff, 0:D], preferred_element_type=jnp.float32)
          + vec_ref[_V_FF_B2:_V_FF_B2 + 1, 0:D])
    x = layer_norm(x + h2, vec_ref[_V_N3G:_V_N3G + 1, 0:D],
                   vec_ref[_V_N3B:_V_N3B + 1, 0:D])

    x_buf[...] = x

    # ---- epilogue (last grid step): linear_mapping (Linear -> tanh -> Linear)
    @pl.when(layer == pl.num_programs(0) - 1)
    def _():
        w1 = edge_ref[eo["map_w1"]:eo["map_w1"] + D, 0:ps]
        b1 = edge_ref[eo["map_b1"]:eo["map_b1"] + 1, 0:ps]
        w2 = edge_ref[eo["map_w2"]:eo["map_w2"] + ps, 0:ps]
        b2 = edge_ref[eo["map_b2"]:eo["map_b2"] + 1, 0:ps]
        m1 = jnp.tanh(jnp.dot(x, w1, preferred_element_type=jnp.float32) + b1)
        o_ref[...] = (jnp.dot(m1, w2, preferred_element_type=jnp.float32) + b2
                      ).astype(o_ref.dtype)


def vit_decoder_stack(patches, mem_flat, packed, cfg):
    D, ff, ps = cfg["embed_dim"], cfg["dim_ff"], cfg["patch_size"]
    P, nl = cfg["num_patches"], cfg["n_layers"]
    Mq, K = patches.shape
    Mk = mem_flat.shape[0]
    B = Mq // P
    Lm = Mk // B

    # Additive masks (trace-time constants): causal within each batch block plus
    # a batch block-diagonal mask so folding the batch into M stays correct.
    rq = jnp.arange(Mq)
    rk = jnp.arange(Mk)
    valid_self = ((rq[:, None] // P) == (rq[None, :] // P)) & \
                 ((rq[None, :] % P) <= (rq[:, None] % P))
    smask = jnp.where(valid_self, 0.0, -1e30).astype(jnp.float32)
    valid_cross = (rq[:, None] // P) == (rk[None, :] // Lm)
    cmask = jnp.where(valid_cross, 0.0, -1e30).astype(jnp.float32)

    edge, wd, vec = packed["edge"], packed["wd"], packed["vec"]
    kernel = functools.partial(
        _vit_decoder_stack_kernel, n_heads=cfg["n_heads"], d_model=D, d_ff=ff,
        patch_size=ps, n_patches=P, n_batch=B, eps=1e-5)

    return pl.pallas_call(
        kernel,
        out_shape=jax.ShapeDtypeStruct((Mq, ps), jnp.float32),
        grid=(nl,),
        in_specs=[
            pl.BlockSpec((Mq, K), lambda l: (0, 0)),                   # patches
            pl.BlockSpec((Mk, D), lambda l: (0, 0)),                   # memory
            pl.BlockSpec((Mq, Mq), lambda l: (0, 0)),                  # self mask
            pl.BlockSpec((Mq, Mk), lambda l: (0, 0)),                  # cross mask
            pl.BlockSpec(edge.shape, lambda l: (0, 0)),                # edge slab
            pl.BlockSpec((None,) + wd.shape[1:], lambda l: (l, 0, 0)),  # layer weights
            pl.BlockSpec((None,) + vec.shape[1:], lambda l: (l, 0, 0)),  # layer vectors
        ],
        out_specs=pl.BlockSpec((Mq, ps), lambda l: (0, 0)),
        scratch_shapes=[pltpu.VMEM((Mq, D), jnp.float32)],             # persistent x
        compiler_params=pltpu.CompilerParams(dimension_semantics=("arbitrary",)),
    )(patches, mem_flat, smask, cmask, edge, wd, vec)


# --------------------------------------------------------------------------- forward

def vit_decoder_forward(packed, src, tgt, cfg):
    B, S, _ = tgt.shape
    ps, D, dv = cfg["patch_size"], cfg["embed_dim"], cfg["dim_val"]
    P = cfg["num_patches"]

    # kernel A: decoder_input_layer
    h = decoder_input(tgt, packed["din"], dv)                          # (B*S, dv)

    # XLA glue: im2col patchify (pure layout plumbing, ~1 KB, stays outside Pallas)
    ph, pw = S // ps, dv // ps
    patches = h.reshape(B, ph, ps, pw, ps).transpose(0, 1, 3, 2, 4).reshape(B * P, ps * ps)

    # kernel B: patch-embed + full decoder stack + linear_mapping
    mem_flat = src.reshape(B * src.shape[1], D)
    out = vit_decoder_stack(patches, mem_flat, packed, cfg)            # (B*P, ps)
    return out.reshape(B, P * ps)


# --------------------------------------------------------------------------- params

def init_params(key, cfg):
    D, dv, ps, ff = cfg["embed_dim"], cfg["dim_val"], cfg["patch_size"], cfg["dim_ff"]

    def nxt():
        nonlocal key
        key, sub = jax.random.split(key)
        return sub

    def w(shape, scale=0.1):
        return (scale * jax.random.normal(nxt(), shape)).astype(jnp.float32)

    def attn_p():
        return {"w_q": w((D, D)), "b_q": w((D,)),
                "w_k": w((D, D)), "b_k": w((D,)),
                "w_v": w((D, D)), "b_v": w((D,)),
                "w_o": w((D, D)), "b_o": w((D,))}

    params = {
        "dec_in_w1": w((cfg["input_size"], dv)), "dec_in_b1": w((dv,)),
        "dec_in_w2": w((dv, dv)), "dec_in_b2": w((dv,)),
        "pat_emd": {
            "proj_w": w((ps * ps, D)),      # Conv2d(1,D,ps,ps) weight, (kh,kw) flattened
            "proj_b": w((D,)),
            "pos_embed": w((1, cfg["num_patches"] + 1, D)),
        },
        "map_w1": w((D, ps)), "map_b1": w((ps,)),
        "map_w2": w((ps, ps)), "map_b2": w((ps,)),
        "layers": [],
    }
    for _ in range(cfg["n_layers"]):
        params["layers"].append({
            "self_attn": attn_p(), "cross_attn": attn_p(),
            "ff_w1": w((D, ff)), "ff_b1": w((ff,)),
            "ff_w2": w((ff, D)), "ff_b2": w((D,)),
            "norm1_g": jnp.ones((D,), jnp.float32), "norm1_b": jnp.zeros((D,), jnp.float32),
            "norm2_g": jnp.ones((D,), jnp.float32), "norm2_b": jnp.zeros((D,), jnp.float32),
            "norm3_g": jnp.ones((D,), jnp.float32), "norm3_b": jnp.zeros((D,), jnp.float32),
        })
    return params


# --------------------------------------------------------------------------- pure-JAX reference

def reference_forward(params, src, tgt, cfg):
    def linear(x, w, b, act=None):
        y = x @ w + b
        if act == "tanh":
            y = jnp.tanh(y)
        elif act == "relu":
            y = jnp.maximum(y, 0.0)
        return y

    def layernorm(x, g, b, eps=1e-5):
        m = x.mean(-1, keepdims=True)
        v = ((x - m) ** 2).mean(-1, keepdims=True)
        return (x - m) / jnp.sqrt(v + eps) * g + b

    def mha(xq, xkv, p, nh, mask):
        B, Lq, D = xq.shape
        Lk = xkv.shape[1]
        hd = D // nh
        q = linear(xq, p["w_q"], p["b_q"]).reshape(B, Lq, nh, hd).transpose(0, 2, 1, 3)
        k = linear(xkv, p["w_k"], p["b_k"]).reshape(B, Lk, nh, hd).transpose(0, 2, 1, 3)
        v = linear(xkv, p["w_v"], p["b_v"]).reshape(B, Lk, nh, hd).transpose(0, 2, 1, 3)
        s = jnp.einsum("bhqd,bhkd->bhqk", q, k) / math.sqrt(hd)
        if mask is not None:
            s = s + mask
        a = jax.nn.softmax(s, axis=-1)
        o = jnp.einsum("bhqk,bhkd->bhqd", a, v).transpose(0, 2, 1, 3).reshape(B, Lq, D)
        return linear(o, p["w_o"], p["b_o"])

    B, S, _ = tgt.shape
    dv, ps, D = cfg["dim_val"], cfg["patch_size"], cfg["embed_dim"]
    h = linear(linear(tgt, params["dec_in_w1"], params["dec_in_b1"], "tanh"),
               params["dec_in_w2"], params["dec_in_b2"])
    ph, pw = S // ps, dv // ps
    patches = h.reshape(B, ph, ps, pw, ps).transpose(0, 1, 3, 2, 4).reshape(B, ph * pw, ps * ps)
    x = patches @ params["pat_emd"]["proj_w"] + params["pat_emd"]["proj_b"]
    x = x + params["pat_emd"]["pos_embed"][:, 1:, :]
    L = x.shape[1]
    row = jnp.arange(L)[:, None]
    col = jnp.arange(L)[None, :]
    mask = jnp.where(col > row, -jnp.inf, 0.0)
    for lp in params["layers"]:
        x = layernorm(x + mha(x, x, lp["self_attn"], cfg["n_heads"], mask),
                      lp["norm1_g"], lp["norm1_b"])
        x = layernorm(x + mha(x, src, lp["cross_attn"], cfg["n_heads"], None),
                      lp["norm2_g"], lp["norm2_b"])
        ff = linear(linear(x, lp["ff_w1"], lp["ff_b1"], "relu"), lp["ff_w2"], lp["ff_b2"])
        x = layernorm(x + ff, lp["norm3_g"], lp["norm3_b"])
    o = linear(linear(x, params["map_w1"], params["map_b1"], "tanh"),
               params["map_w2"], params["map_b2"])
    return o.reshape(B, -1)


# --------------------------------------------------------------------------- main

if __name__ == "__main__":
    # Small, internally-consistent configuration implied by the forward pass:
    # tgt (B,16,1) -> decoder_input -> (B,16,8) -> 4x4 patches -> 8 tokens, so
    # out_seq_len == num_patches == 8 and seq_size == 16*8 == 128.
    cfg = dict(input_size=1, dim_val=8, patch_size=4, embed_dim=32, n_heads=4,
               dim_ff=64, n_layers=2, tgt_len=16, mem_len=8, batch=2)
    cfg["num_patches"] = (cfg["tgt_len"] // cfg["patch_size"]) * (cfg["dim_val"] // cfg["patch_size"])

    key = jax.random.PRNGKey(0)
    kp, ks, kt = jax.random.split(key, 3)
    params = init_params(kp, cfg)
    packed = pack_params(params, cfg)   # weight packing hoisted out of the forward
    src = jax.random.normal(ks, (cfg["batch"], cfg["mem_len"], cfg["embed_dim"]), jnp.float32)
    tgt = jax.random.normal(kt, (cfg["batch"], cfg["tgt_len"], cfg["input_size"]), jnp.float32)

    fwd = jax.jit(lambda p, s, t: vit_decoder_forward(p, s, t, cfg))
    out = jax.block_until_ready(fwd(packed, src, tgt))

    ref = reference_forward(params, src, tgt, cfg)
    np.testing.assert_allclose(np.asarray(out), np.asarray(ref), atol=1e-2, rtol=1e-2)
    assert out.shape == (cfg["batch"], cfg["num_patches"] * cfg["patch_size"])
    print("KERNEL_OK")
</pallas_src>

<mosaic_0001>
module attributes {stable_mosaic.version = 11 : i64} {
  func.func @_dec_input_kernel(%arg0: i32, %arg1: memref<32x1xf32, #tpu.memory_space<vmem>>, %arg2: memref<16x8xf32, #tpu.memory_space<vmem>>, %arg3: memref<32x8xf32, #tpu.memory_space<vmem>>) attributes {dimension_semantics = [#tpu.dimension_semantics<arbitrary>], iteration_bounds = array<i64: 1>, scalar_prefetch = 0 : i64, scratch_operands = 0 : i64, tpu.core_type = #tpu.core_type<tc>, window_params = [{pipeline_mode = #tpu.pipeline_mode<synchronous>, transform_indices = @transform_0, window_bounds = array<i64: 32, 1>}, {pipeline_mode = #tpu.pipeline_mode<synchronous>, transform_indices = @transform_1, window_bounds = array<i64: 16, 8>}, {pipeline_mode = #tpu.pipeline_mode<synchronous>, transform_indices = @transform_2, window_bounds = array<i64: 32, 8>}]} {
    %c0 = arith.constant 0 : index
    %c0_0 = arith.constant 0 : index
    %0 = vector.load %arg1[%c0, %c0_0] : memref<32x1xf32, #tpu.memory_space<vmem>>, vector<32x1xf32>
    %c0_1 = arith.constant 0 : index
    %c0_2 = arith.constant 0 : index
    %1 = vector.load %arg2[%c0_1, %c0_2] : memref<16x8xf32, #tpu.memory_space<vmem>>, vector<1x8xf32>
    %c1 = arith.constant 1 : index
    %c0_3 = arith.constant 0 : index
    %2 = vector.load %arg2[%c1, %c0_3] : memref<16x8xf32, #tpu.memory_space<vmem>>, vector<1x8xf32>
    %c2 = arith.constant 2 : index
    %c0_4 = arith.constant 0 : index
    %3 = vector.load %arg2[%c2, %c0_4] : memref<16x8xf32, #tpu.memory_space<vmem>>, vector<1x8xf32>
    %c8 = arith.constant 8 : index
    %c0_5 = arith.constant 0 : index
    %4 = vector.load %arg2[%c8, %c0_5] : memref<16x8xf32, #tpu.memory_space<vmem>>, vector<8x8xf32>
    %5 = vector.broadcast %0 : vector<32x1xf32> to vector<32x8xf32>
    %6 = vector.broadcast %1 : vector<1x8xf32> to vector<32x8xf32>
    %7 = arith.mulf %5, %6 : vector<32x8xf32>
    %8 = vector.broadcast %2 : vector<1x8xf32> to vector<32x8xf32>
    %9 = arith.addf %7, %8 : vector<32x8xf32>
    %10 = math.tanh %9 : vector<32x8xf32>
    %cst = arith.constant dense<0.000000e+00> : vector<32x8xf32>
    %11 = tpu.matmul %10, %4, %cst {dimension_numbers = #tpu.dot_dimension_numbers<[1], [0], [0], [1], [0, 0, 1, 1], [], []>} : vector<32x8xf32>, vector<8x8xf32>, vector<32x8xf32> -> vector<32x8xf32>
    %12 = vector.broadcast %3 : vector<1x8xf32> to vector<32x8xf32>
    %13 = arith.addf %11, %12 : vector<32x8xf32>
    %c0_6 = arith.constant 0 : index
    %c0_7 = arith.constant 0 : index
    %14 = vector.load %arg3[%c0_6, %c0_7] : memref<32x8xf32, #tpu.memory_space<vmem>>, vector<32x8xf32>
    tpu.vector_store %arg3[%c0_6, %c0_7], %13 {strides = array<i32>} : memref<32x8xf32, #tpu.memory_space<vmem>>, vector<32x8xf32>,
    return
  }
  func.func @transform_0(%arg0: i32) -> (i32, i32) {
    %c0_i32 = arith.constant 0 : i32
    %c0_i32_0 = arith.constant 0 : i32
    %c0_i32_1 = arith.constant 0 : i32
    return %c0_i32, %c0_i32_0 : i32, i32
  }
  func.func @transform_1(%arg0: i32) -> (i32, i32) {
    %c0_i32 = arith.constant 0 : i32
    %c0_i32_0 = arith.constant 0 : i32
    %c0_i32_1 = arith.constant 0 : i32
    return %c0_i32, %c0_i32_0 : i32, i32
  }
  func.func @transform_2(%arg0: i32) -> (i32, i32) {
    %c0_i32 = arith.constant 0 : i32
    %c0_i32_0 = arith.constant 0 : i32
    %c0_i32_1 = arith.constant 0 : i32
    return %c0_i32, %c0_i32_0 : i32, i32
  }
}

module attributes {stable_mosaic.version = 11 : i64} {
  func.func @_vit_decoder_stack_kernel(%arg0: i32, %arg1: memref<16x16xf32, #tpu.memory_space<vmem>>, %arg2: memref<16x32xf32, #tpu.memory_space<vmem>>, %arg3: memref<16x16xf32, #tpu.memory_space<vmem>>, %arg4: memref<16x16xf32, #tpu.memory_space<vmem>>, %arg5: memref<88x32xf32, #tpu.memory_space<vmem>>, %arg6: memref<1x256x96xf32, #tpu.memory_space<vmem>>, %arg7: memref<1x16x96xf32, #tpu.memory_space<vmem>>, %arg8: memref<16x4xf32, #tpu.memory_space<vmem>>, %arg9: memref<16x32xf32, #tpu.memory_space<vmem>>) attributes {dimension_semantics = [#tpu.dimension_semantics<arbitrary>], iteration_bounds = array<i64: 2>, scalar_prefetch = 0 : i64, scratch_operands = 1 : i64, tpu.core_type = #tpu.core_type<tc>, window_params = [{pipeline_mode = #tpu.pipeline_mode<synchronous>, transform_indices = @transform_0, window_bounds = array<i64: 16, 16>}, {pipeline_mode = #tpu.pipeline_mode<synchronous>, transform_indices = @transform_1, window_bounds = array<i64: 16, 32>}, {pipeline_mode = #tpu.pipeline_mode<synchronous>, transform_indices = @transform_2, window_bounds = array<i64: 16, 16>}, {pipeline_mode = #tpu.pipeline_mode<synchronous>, transform_indices = @transform_3, window_bounds = array<i64: 16, 16>}, {pipeline_mode = #tpu.pipeline_mode<synchronous>, transform_indices = @transform_4, window_bounds = array<i64: 88, 32>}, {transform_indices = @transform_5, window_bounds = array<i64: 1, 256, 96>}, {transform_indices = @transform_6, window_bounds = array<i64: 1, 16, 96>}, {pipeline_mode = #tpu.pipeline_mode<synchronous>, transform_indices = @transform_7, window_bounds = array<i64: 16, 4>}]} {
    %c0_i32 = arith.constant 0 : i32
    %0 = arith.cmpi eq, %arg0, %c0_i32 : i32
    %1 = arith.extui %0 : i1 to i32
    %c0_i32_0 = arith.constant 0 : i32
    %2 = arith.cmpi ne, %1, %c0_i32_0 : i32
    scf.if %2 {
      %c0_115 = arith.constant 0 : index
      %c0_116 = arith.constant 0 : index
      %288 = vector.load %arg5[%c0_115, %c0_116] : memref<88x32xf32, #tpu.memory_space<vmem>>, vector<16x32xf32>
      %c24 = arith.constant 24 : index
      %c0_117 = arith.constant 0 : index
      %289 = vector.load %arg5[%c24, %c0_117] : memref<88x32xf32, #tpu.memory_space<vmem>>, vector<1x32xf32>
      %c16 = arith.constant 16 : index
      %c0_118 = arith.constant 0 : index
      %290 = vector.load %arg5[%c16, %c0_118] : memref<88x32xf32, #tpu.memory_space<vmem>>, vector<8x32xf32>
      %c0_119 = arith.constant 0 : index
      %c0_120 = arith.constant 0 : index
      %291 = vector.load %arg1[%c0_119, %c0_120] : memref<16x16xf32, #tpu.memory_space<vmem>>, vector<16x16xf32>
      %cst_121 = arith.constant dense<0.000000e+00> : vector<16x32xf32>
      %292 = tpu.matmul %291, %288, %cst_121 {dimension_numbers = #tpu.dot_dimension_numbers<[1], [0], [0], [1], [0, 0, 1, 1], [], []>} : vector<16x16xf32>, vector<16x32xf32>, vector<16x32xf32> -> vector<16x32xf32>
      %293 = vector.broadcast %289 : vector<1x32xf32> to vector<16x32xf32>
      %294 = arith.addf %292, %293 : vector<16x32xf32>
      %295 = tpu.concatenate %290, %290 in 0 : vector<8x32xf32>, vector<8x32xf32> -> vector<16x32xf32>
      %296 = arith.addf %294, %295 : vector<16x32xf32>
      %c0_122 = arith.constant 0 : index
      %c0_123 = arith.constant 0 : index
      %297 = vector.load %arg9[%c0_122, %c0_123] : memref<16x32xf32, #tpu.memory_space<vmem>>, vector<16x32xf32>
      tpu.vector_store %arg9[%c0_122, %c0_123], %296 {strides = array<i32>} : memref<16x32xf32, #tpu.memory_space<vmem>>, vector<16x32xf32>,
    } else {
    }
    %c0 = arith.constant 0 : index
    %c0_1 = arith.constant 0 : index
    %3 = vector.load %arg9[%c0, %c0_1] : memref<16x32xf32, #tpu.memory_space<vmem>>, vector<16x32xf32>
    %c0_2 = arith.constant 0 : index
    %c0_3 = arith.constant 0 : index
    %c0_4 = arith.constant 0 : index
    %4 = vector.load %arg6[%c0_2, %c0_3, %c0_4] : memref<1x256x96xf32, #tpu.memory_space<vmem>>, vector<1x32x96xf32>
    %5 = vector.shape_cast %4 : vector<1x32x96xf32> to vector<32x96xf32>
    %cst = arith.constant dense<0.000000e+00> : vector<16x96xf32>
    %6 = tpu.matmul %3, %5, %cst {dimension_numbers = #tpu.dot_dimension_numbers<[1], [0], [0], [1], [0, 0, 1, 1], [], []>} : vector<16x32xf32>, vector<32x96xf32>, vector<16x96xf32> -> vector<16x96xf32>
    %c0_5 = arith.constant 0 : index
    %c0_6 = arith.constant 0 : index
    %c0_7 = arith.constant 0 : index
    %7 = vector.load %arg7[%c0_5, %c0_6, %c0_7] : memref<1x16x96xf32, #tpu.memory_space<vmem>>, vector<1x1x96xf32>
    %8 = vector.shape_cast %7 : vector<1x1x96xf32> to vector<1x96xf32>
    %9 = vector.broadcast %8 : vector<1x96xf32> to vector<16x96xf32>
    %10 = arith.addf %6, %9 : vector<16x96xf32>
    %11 = vector.extract_strided_slice %10 {offsets = [0, 0], sizes = [16, 32], strides = [1, 1]} : vector<16x96xf32> to vector<16x32xf32>
    %12 = vector.extract_strided_slice %10 {offsets = [0, 32], sizes = [16, 32], strides = [1, 1]} : vector<16x96xf32> to vector<16x32xf32>
    %13 = vector.extract_strided_slice %10 {offsets = [0, 64], sizes = [16, 32], strides = [1, 1]} : vector<16x96xf32> to vector<16x32xf32>
    %c0_8 = arith.constant 0 : index
    %c0_9 = arith.constant 0 : index
    %14 = vector.load %arg3[%c0_8, %c0_9] : memref<16x16xf32, #tpu.memory_space<vmem>>, vector<16x16xf32>
    %15 = vector.extract_strided_slice %11 {offsets = [0, 0], sizes = [16, 8], strides = [1, 1]} : vector<16x32xf32> to vector<16x8xf32>
    %16 = vector.extract_strided_slice %12 {offsets = [0, 0], sizes = [16, 8], strides = [1, 1]} : vector<16x32xf32> to vector<16x8xf32>
    %17 = vector.extract_strided_slice %13 {offsets = [0, 0], sizes = [16, 8], strides = [1, 1]} : vector<16x32xf32> to vector<16x8xf32>
    %cst_10 = arith.constant dense<0.000000e+00> : vector<16x16xf32>
    %18 = tpu.matmul %15, %16, %cst_10 {dimension_numbers = #tpu.dot_dimension_numbers<[1], [1], [0], [0], [0, 0, 1, 0], [], []>} : vector<16x8xf32>, vector<16x8xf32>, vector<16x16xf32> -> vector<16x16xf32>
    %cst_11 = arith.constant 0.353553385 : f32
    %19 = vector.broadcast %cst_11 : f32 to vector<16x16xf32>
    %20 = arith.mulf %18, %19 : vector<16x16xf32>
    %21 = arith.addf %20, %14 : vector<16x16xf32>
    %cst_12 = arith.constant dense<0xFF800000> : vector<16xf32>
    %22 = vector.multi_reduction <maximumf>, %21, %cst_12 [1] : vector<16x16xf32> to vector<16xf32>
    %23 = vector.shape_cast %22 : vector<16xf32> to vector<16x1xf32>
    %24 = vector.broadcast %23 : vector<16x1xf32> to vector<16x16xf32>
    %25 = arith.subf %21, %24 : vector<16x16xf32>
    %26 = math.exp %25 : vector<16x16xf32>
    %cst_13 = arith.constant dense<0.000000e+00> : vector<16xf32>
    %27 = vector.multi_reduction <add>, %26, %cst_13 [1] : vector<16x16xf32> to vector<16xf32>
    %28 = vector.shape_cast %27 : vector<16xf32> to vector<16x1xf32>
    %29 = tpu.reciprocal %28 {approx = true} : vector<16x1xf32> -> vector<16x1xf32>
    %30 = vector.broadcast %29 : vector<16x1xf32> to vector<16x16xf32>
    %31 = arith.mulf %26, %30 : vector<16x16xf32>
    %cst_14 = arith.constant dense<0.000000e+00> : vector<16x8xf32>
    %32 = tpu.matmul %31, %17, %cst_14 {dimension_numbers = #tpu.dot_dimension_numbers<[1], [0], [0], [1], [0, 0, 1, 1], [], []>} : vector<16x16xf32>, vector<16x8xf32>, vector<16x8xf32> -> vector<16x8xf32>
    %33 = vector.extract_strided_slice %11 {offsets = [0, 8], sizes = [16, 8], strides = [1, 1]} : vector<16x32xf32> to vector<16x8xf32>
    %34 = vector.extract_strided_slice %12 {offsets = [0, 8], sizes = [16, 8], strides = [1, 1]} : vector<16x32xf32> to vector<16x8xf32>
    %35 = vector.extract_strided_slice %13 {offsets = [0, 8], sizes = [16, 8], strides = [1, 1]} : vector<16x32xf32> to vector<16x8xf32>
    %cst_15 = arith.constant dense<0.000000e+00> : vector<16x16xf32>
    %36 = tpu.matmul %33, %34, %cst_15 {dimension_numbers = #tpu.dot_dimension_numbers<[1], [1], [0], [0], [0, 0, 1, 0], [], []>} : vector<16x8xf32>, vector<16x8xf32>, vector<16x16xf32> -> vector<16x16xf32>
    %cst_16 = arith.constant 0.353553385 : f32
    %37 = vector.broadcast %cst_16 : f32 to vector<16x16xf32>
    %38 = arith.mulf %36, %37 : vector<16x16xf32>
    %39 = arith.addf %38, %14 : vector<16x16xf32>
    %cst_17 = arith.constant dense<0xFF800000> : vector<16xf32>
    %40 = vector.multi_reduction <maximumf>, %39, %cst_17 [1] : vector<16x16xf32> to vector<16xf32>
    %41 = vector.shape_cast %40 : vector<16xf32> to vector<16x1xf32>
    %42 = vector.broadcast %41 : vector<16x1xf32> to vector<16x16xf32>
    %43 = arith.subf %39, %42 : vector<16x16xf32>
    %44 = math.exp %43 : vector<16x16xf32>
    %cst_18 = arith.constant dense<0.000000e+00> : vector<16xf32>
    %45 = vector.multi_reduction <add>, %44, %cst_18 [1] : vector<16x16xf32> to vector<16xf32>
    %46 = vector.shape_cast %45 : vector<16xf32> to vector<16x1xf32>
    %47 = tpu.reciprocal %46 {approx = true} : vector<16x1xf32> -> vector<16x1xf32>
    %48 = vector.broadcast %47 : vector<16x1xf32> to vector<16x16xf32>
    %49 = arith.mulf %44, %48 : vector<16x16xf32>
    %cst_19 = arith.constant dense<0.000000e+00> : vector<16x8xf32>
    %50 = tpu.matmul %49, %35, %cst_19 {dimension_numbers = #tpu.dot_dimension_numbers<[1], [0], [0], [1], [0, 0, 1, 1], [], []>} : vector<16x16xf32>, vector<16x8xf32>, vector<16x8xf32> -> vector<16x8xf32>
    %51 = vector.extract_strided_slice %11 {offsets = [0, 16], sizes = [16, 8], strides = [1, 1]} : vector<16x32xf32> to vector<16x8xf32>
    %52 = vector.extract_strided_slice %12 {offsets = [0, 16], sizes = [16, 8], strides = [1, 1]} : vector<16x32xf32> to vector<16x8xf32>
    %53 = vector.extract_strided_slice %13 {offsets = [0, 16], sizes = [16, 8], strides = [1, 1]} : vector<16x32xf32> to vector<16x8xf32>
    %cst_20 = arith.constant dense<0.000000e+00> : vector<16x16xf32>
    %54 = tpu.matmul %51, %52, %cst_20 {dimension_numbers = #tpu.dot_dimension_numbers<[1], [1], [0], [0], [0, 0, 1, 0], [], []>} : vector<16x8xf32>, vector<16x8xf32>, vector<16x16xf32> -> vector<16x16xf32>
    %cst_21 = arith.constant 0.353553385 : f32
    %55 = vector.broadcast %cst_21 : f32 to vector<16x16xf32>
    %56 = arith.mulf %54, %55 : vector<16x16xf32>
    %57 = arith.addf %56, %14 : vector<16x16xf32>
    %cst_22 = arith.constant dense<0xFF800000> : vector<16xf32>
    %58 = vector.multi_reduction <maximumf>, %57, %cst_22 [1] : vector<16x16xf32> to vector<16xf32>
    %59 = vector.shape_cast %58 : vector<16xf32> to vector<16x1xf32>
    %60 = vector.broadcast %59 : vector<16x1xf32> to vector<16x16xf32>
    %61 = arith.subf %57, %60 : vector<16x16xf32>
    %62 = math.exp %61 : vector<16x16xf32>
    %cst_23 = arith.constant dense<0.000000e+00> : vector<16xf32>
    %63 = vector.multi_reduction <add>, %62, %cst_23 [1] : vector<16x16xf32> to vector<16xf32>
    %64 = vector.shape_cast %63 : vector<16xf32> to vector<16x1xf32>
    %65 = tpu.reciprocal %64 {approx = true} : vector<16x1xf32> -> vector<16x1xf32>
    %66 = vector.broadcast %65 : vector<16x1xf32> to vector<16x16xf32>
    %67 = arith.mulf %62, %66 : vector<16x16xf32>
    %cst_24 = arith.constant dense<0.000000e+00> : vector<16x8xf32>
    %68 = tpu.matmul %67, %53, %cst_24 {dimension_numbers = #tpu.dot_dimension_numbers<[1], [0], [0], [1], [0, 0, 1, 1], [], []>} : vector<16x16xf32>, vector<16x8xf32>, vector<16x8xf32> -> vector<16x8xf32>
    %69 = vector.extract_strided_slice %11 {offsets = [0, 24], sizes = [16, 8], strides = [1, 1]} : vector<16x32xf32> to vector<16x8xf32>
    %70 = vector.extract_strided_slice %12 {offsets = [0, 24], sizes = [16, 8], strides = [1, 1]} : vector<16x32xf32> to vector<16x8xf32>
    %71 = vector.extract_strided_slice %13 {offsets = [0, 24], sizes = [16, 8], strides = [1, 1]} : vector<16x32xf32> to vector<16x8xf32>
    %cst_25 = arith.constant dense<0.000000e+00> : vector<16x16xf32>
    %72 = tpu.matmul %69, %70, %cst_25 {dimension_numbers = #tpu.dot_dimension_numbers<[1], [1], [0], [0], [0, 0, 1, 0], [], []>} : vector<16x8xf32>, vector<16x8xf32>, vector<16x16xf32> -> vector<16x16xf32>
    %cst_26 = arith.constant 0.353553385 : f32
    %73 = vector.broadcast %cst_26 : f32 to vector<16x16xf32>
    %74 = arith.mulf %72, %73 : vector<16x16xf32>
    %75 = arith.addf %74, %14 : vector<16x16xf32>
    %cst_27 = arith.constant dense<0xFF800000> : vector<16xf32>
    %76 = vector.multi_reduction <maximumf>, %75, %cst_27 [1] : vector<16x16xf32> to vector<16xf32>
    %77 = vector.shape_cast %76 : vector<16xf32> to vector<16x1xf32>
    %78 = vector.broadcast %77 : vector<16x1xf32> to vector<16x16xf32>
    %79 = arith.subf %75, %78 : vector<16x16xf32>
    %80 = math.exp %79 : vector<16x16xf32>
    %cst_28 = arith.constant dense<0.000000e+00> : vector<16xf32>
    %81 = vector.multi_reduction <add>, %80, %cst_28 [1] : vector<16x16xf32> to vector<16xf32>
    %82 = vector.shape_cast %81 : vector<16xf32> to vector<16x1xf32>
    %83 = tpu.reciprocal %82 {approx = true} : vector<16x1xf32> -> vector<16x1xf32>
    %84 = vector.broadcast %83 : vector<16x1xf32> to vector<16x16xf32>
    %85 = arith.mulf %80, %84 : vector<16x16xf32>
    %cst_29 = arith.constant dense<0.000000e+00> : vector<16x8xf32>
    %86 = tpu.matmul %85, %71, %cst_29 {dimension_numbers = #tpu.dot_dimension_numbers<[1], [0], [0], [1], [0, 0, 1, 1], [], []>} : vector<16x16xf32>, vector<16x8xf32>, vector<16x8xf32> -> vector<16x8xf32>
    %87 = tpu.concatenate %32, %50, %68, %86 in 1 : vector<16x8xf32>, vector<16x8xf32>, vector<16x8xf32>, vector<16x8xf32> -> vector<16x32xf32>
    %c0_30 = arith.constant 0 : index
    %c32 = arith.constant 32 : index
    %c0_31 = arith.constant 0 : index
    %88 = vector.load %arg6[%c0_30, %c32, %c0_31] : memref<1x256x96xf32, #tpu.memory_space<vmem>>, vector<1x32x32xf32>
    %89 = vector.shape_cast %88 : vector<1x32x32xf32> to vector<32x32xf32>
    %cst_32 = arith.constant dense<0.000000e+00> : vector<16x32xf32>
    %90 = tpu.matmul %87, %89, %cst_32 {dimension_numbers = #tpu.dot_dimension_numbers<[1], [0], [0], [1], [0, 0, 1, 1], [], []>} : vector<16x32xf32>, vector<32x32xf32>, vector<16x32xf32> -> vector<16x32xf32>
    %c0_33 = arith.constant 0 : index
    %c1 = arith.constant 1 : index
    %c0_34 = arith.constant 0 : index
    %91 = vector.load %arg7[%c0_33, %c1, %c0_34] : memref<1x16x96xf32, #tpu.memory_space<vmem>>, vector<1x1x32xf32>
    %92 = vector.shape_cast %91 : vector<1x1x32xf32> to vector<1x32xf32>
    %93 = vector.broadcast %92 : vector<1x32xf32> to vector<16x32xf32>
    %94 = arith.addf %90, %93 : vector<16x32xf32>
    %95 = arith.addf %3, %94 : vector<16x32xf32>
    %c0_35 = arith.constant 0 : index
    %c7 = arith.constant 7 : index
    %c0_36 = arith.constant 0 : index
    %96 = vector.load %arg7[%c0_35, %c7, %c0_36] : memref<1x16x96xf32, #tpu.memory_space<vmem>>, vector<1x1x32xf32>
    %97 = vector.shape_cast %96 : vector<1x1x32xf32> to vector<1x32xf32>
    %c0_37 = arith.constant 0 : index
    %c8 = arith.constant 8 : index
    %c0_38 = arith.constant 0 : index
    %98 = vector.load %arg7[%c0_37, %c8, %c0_38] : memref<1x16x96xf32, #tpu.memory_space<vmem>>, vector<1x1x32xf32>
    %99 = vector.shape_cast %98 : vector<1x1x32xf32> to vector<1x32xf32>
    %cst_39 = arith.constant dense<0.000000e+00> : vector<16xf32>
    %100 = vector.multi_reduction <add>, %95, %cst_39 [1] : vector<16x32xf32> to vector<16xf32>
    %101 = vector.shape_cast %100 : vector<16xf32> to vector<16x1xf32>
    %cst_40 = arith.constant 3.200000e+01 : f32
    %102 = vector.broadcast %cst_40 : f32 to vector<16x1xf32>
    %103 = arith.divf %101, %102 : vector<16x1xf32>
    %104 = vector.broadcast %103 : vector<16x1xf32> to vector<16x32xf32>
    %105 = arith.subf %95, %104 : vector<16x32xf32>
    %106 = arith.mulf %105, %105 : vector<16x32xf32>
    %cst_41 = arith.constant dense<0.000000e+00> : vector<16xf32>
    %107 = vector.multi_reduction <add>, %106, %cst_41 [1] : vector<16x32xf32> to vector<16xf32>
    %108 = vector.shape_cast %107 : vector<16xf32> to vector<16x1xf32>
    %cst_42 = arith.constant 3.200000e+01 : f32
    %109 = vector.broadcast %cst_42 : f32 to vector<16x1xf32>
    %110 = arith.divf %108, %109 : vector<16x1xf32>
    %cst_43 = arith.constant 9.99999974E-6 : f32
    %111 = vector.broadcast %cst_43 : f32 to vector<16x1xf32>
    %112 = arith.addf %110, %111 : vector<16x1xf32>
    %113 = math.rsqrt %112 : vector<16x1xf32>
    %114 = vector.broadcast %113 : vector<16x1xf32> to vector<16x32xf32>
    %115 = arith.mulf %105, %114 : vector<16x32xf32>
    %116 = vector.broadcast %97 : vector<1x32xf32> to vector<16x32xf32>
    %117 = arith.mulf %115, %116 : vector<16x32xf32>
    %118 = vector.broadcast %99 : vector<1x32xf32> to vector<16x32xf32>
    %119 = arith.addf %117, %118 : vector<16x32xf32>
    %c0_44 = arith.constant 0 : index
    %c64 = arith.constant 64 : index
    %c0_45 = arith.constant 0 : index
    %120 = vector.load %arg6[%c0_44, %c64, %c0_45] : memref<1x256x96xf32, #tpu.memory_space<vmem>>, vector<1x32x32xf32>
    %121 = vector.shape_cast %120 : vector<1x32x32xf32> to vector<32x32xf32>
    %cst_46 = arith.constant dense<0.000000e+00> : vector<16x32xf32>
    %122 = tpu.matmul %119, %121, %cst_46 {dimension_numbers = #tpu.dot_dimension_numbers<[1], [0], [0], [1], [0, 0, 1, 1], [], []>} : vector<16x32xf32>, vector<32x32xf32>, vector<16x32xf32> -> vector<16x32xf32>
    %c0_47 = arith.constant 0 : index
    %c2 = arith.constant 2 : index
    %c0_48 = arith.constant 0 : index
    %123 = vector.load %arg7[%c0_47, %c2, %c0_48] : memref<1x16x96xf32, #tpu.memory_space<vmem>>, vector<1x1x32xf32>
    %124 = vector.shape_cast %123 : vector<1x1x32xf32> to vector<1x32xf32>
    %125 = vector.broadcast %124 : vector<1x32xf32> to vector<16x32xf32>
    %126 = arith.addf %122, %125 : vector<16x32xf32>
    %c0_49 = arith.constant 0 : index
    %c0_50 = arith.constant 0 : index
    %127 = vector.load %arg2[%c0_49, %c0_50] : memref<16x32xf32, #tpu.memory_space<vmem>>, vector<16x32xf32>
    %c0_51 = arith.constant 0 : index
    %c96 = arith.constant 96 : index
    %c0_52 = arith.constant 0 : index
    %128 = vector.load %arg6[%c0_51, %c96, %c0_52] : memref<1x256x96xf32, #tpu.memory_space<vmem>>, vector<1x32x64xf32>
    %129 = vector.shape_cast %128 : vector<1x32x64xf32> to vector<32x64xf32>
    %cst_53 = arith.constant dense<0.000000e+00> : vector<16x64xf32>
    %130 = tpu.matmul %127, %129, %cst_53 {dimension_numbers = #tpu.dot_dimension_numbers<[1], [0], [0], [1], [0, 0, 1, 1], [], []>} : vector<16x32xf32>, vector<32x64xf32>, vector<16x64xf32> -> vector<16x64xf32>
    %c0_54 = arith.constant 0 : index
    %c3 = arith.constant 3 : index
    %c0_55 = arith.constant 0 : index
    %131 = vector.load %arg7[%c0_54, %c3, %c0_55] : memref<1x16x96xf32, #tpu.memory_space<vmem>>, vector<1x1x64xf32>
    %132 = vector.shape_cast %131 : vector<1x1x64xf32> to vector<1x64xf32>
    %133 = vector.broadcast %132 : vector<1x64xf32> to vector<16x64xf32>
    %134 = arith.addf %130, %133 : vector<16x64xf32>
    %135 = vector.extract_strided_slice %134 {offsets = [0, 0], sizes = [16, 32], strides = [1, 1]} : vector<16x64xf32> to vector<16x32xf32>
    %136 = vector.extract_strided_slice %134 {offsets = [0, 32], sizes = [16, 32], strides = [1, 1]} : vector<16x64xf32> to vector<16x32xf32>
    %c0_56 = arith.constant 0 : index
    %c0_57 = arith.constant 0 : index
    %137 = vector.load %arg4[%c0_56, %c0_57] : memref<16x16xf32, #tpu.memory_space<vmem>>, vector<16x16xf32>
    %138 = vector.extract_strided_slice %126 {offsets = [0, 0], sizes = [16, 8], strides = [1, 1]} : vector<16x32xf32> to vector<16x8xf32>
    %139 = vector.extract_strided_slice %135 {offsets = [0, 0], sizes = [16, 8], strides = [1, 1]} : vector<16x32xf32> to vector<16x8xf32>
    %140 = vector.extract_strided_slice %136 {offsets = [0, 0], sizes = [16, 8], strides = [1, 1]} : vector<16x32xf32> to vector<16x8xf32>
    %cst_58 = arith.constant dense<0.000000e+00> : vector<16x16xf32>
    %141 = tpu.matmul %138, %139, %cst_58 {dimension_numbers = #tpu.dot_dimension_numbers<[1], [1], [0], [0], [0, 0, 1, 0], [], []>} : vector<16x8xf32>, vector<16x8xf32>, vector<16x16xf32> -> vector<16x16xf32>
    %cst_59 = arith.constant 0.353553385 : f32
    %142 = vector.broadcast %cst_59 : f32 to vector<16x16xf32>
    %143 = arith.mulf %141, %142 : vector<16x16xf32>
    %144 = arith.addf %143, %137 : vector<16x16xf32>
    %cst_60 = arith.constant dense<0xFF800000> : vector<16xf32>
    %145 = vector.multi_reduction <maximumf>, %144, %cst_60 [1] : vector<16x16xf32> to vector<16xf32>
    %146 = vector.shape_cast %145 : vector<16xf32> to vector<16x1xf32>
    %147 = vector.broadcast %146 : vector<16x1xf32> to vector<16x16xf32>
    %148 = arith.subf %144, %147 : vector<16x16xf32>
    %149 = math.exp %148 : vector<16x16xf32>
    %cst_61 = arith.constant dense<0.000000e+00> : vector<16xf32>
    %150 = vector.multi_reduction <add>, %149, %cst_61 [1] : vector<16x16xf32> to vector<16xf32>
    %151 = vector.shape_cast %150 : vector<16xf32> to vector<16x1xf32>
    %152 = tpu.reciprocal %151 {approx = true} : vector<16x1xf32> -> vector<16x1xf32>
    %153 = vector.broadcast %152 : vector<16x1xf32> to vector<16x16xf32>
    %154 = arith.mulf %149, %153 : vector<16x16xf32>
    %cst_62 = arith.constant dense<0.000000e+00> : vector<16x8xf32>
    %155 = tpu.matmul %154, %140, %cst_62 {dimension_numbers = #tpu.dot_dimension_numbers<[1], [0], [0], [1], [0, 0, 1, 1], [], []>} : vector<16x16xf32>, vector<16x8xf32>, vector<16x8xf32> -> vector<16x8xf32>
    %156 = vector.extract_strided_slice %126 {offsets = [0, 8], sizes = [16, 8], strides = [1, 1]} : vector<16x32xf32> to vector<16x8xf32>
    %157 = vector.extract_strided_slice %135 {offsets = [0, 8], sizes = [16, 8], strides = [1, 1]} : vector<16x32xf32> to vector<16x8xf32>
    %158 = vector.extract_strided_slice %136 {offsets = [0, 8], sizes = [16, 8], strides = [1, 1]} : vector<16x32xf32> to vector<16x8xf32>
    %cst_63 = arith.constant dense<0.000000e+00> : vector<16x16xf32>
    %159 = tpu.matmul %156, %157, %cst_63 {dimension_numbers = #tpu.dot_dimension_numbers<[1], [1], [0], [0], [0, 0, 1, 0], [], []>} : vector<16x8xf32>, vector<16x8xf32>, vector<16x16xf32> -> vector<16x16xf32>
    %cst_64 = arith.constant 0.353553385 : f32
    %160 = vector.broadcast %cst_64 : f32 to vector<16x16xf32>
    %161 = arith.mulf %159, %160 : vector<16x16xf32>
    %162 = arith.addf %161, %137 : vector<16x16xf32>
    %cst_65 = arith.constant dense<0xFF800000> : vector<16xf32>
    %163 = vector.multi_reduction <maximumf>, %162, %cst_65 [1] : vector<16x16xf32> to vector<16xf32>
    %164 = vector.shape_cast %163 : vector<16xf32> to vector<16x1xf32>
    %165 = vector.broadcast %164 : vector<16x1xf32> to vector<16x16xf32>
    %166 = arith.subf %162, %165 : vector<16x16xf32>
    %167 = math.exp %166 : vector<16x16xf32>
    %cst_66 = arith.constant dense<0.000000e+00> : vector<16xf32>
    %168 = vector.multi_reduction <add>, %167, %cst_66 [1] : vector<16x16xf32> to vector<16xf32>
    %169 = vector.shape_cast %168 : vector<16xf32> to vector<16x1xf32>
    %170 = tpu.reciprocal %169 {approx = true} : vector<16x1xf32> -> vector<16x1xf32>
    %171 = vector.broadcast %170 : vector<16x1xf32> to vector<16x16xf32>
    %172 = arith.mulf %167, %171 : vector<16x16xf32>
    %cst_67 = arith.constant dense<0.000000e+00> : vector<16x8xf32>
    %173 = tpu.matmul %172, %158, %cst_67 {dimension_numbers = #tpu.dot_dimension_numbers<[1], [0], [0], [1], [0, 0, 1, 1], [], []>} : vector<16x16xf32>, vector<16x8xf32>, vector<16x8xf32> -> vector<16x8xf32>
    %174 = vector.extract_strided_slice %126 {offsets = [0, 16], sizes = [16, 8], strides = [1, 1]} : vector<16x32xf32> to vector<16x8xf32>
    %175 = vector.extract_strided_slice %135 {offsets = [0, 16], sizes = [16, 8], strides = [1, 1]} : vector<16x32xf32> to vector<16x8xf32>
    %176 = vector.extract_strided_slice %136 {offsets = [0, 16], sizes = [16, 8], strides = [1, 1]} : vector<16x32xf32> to vector<16x8xf32>
    %cst_68 = arith.constant dense<0.000000e+00> : vector<16x16xf32>
    %177 = tpu.matmul %174, %175, %cst_68 {dimension_numbers = #tpu.dot_dimension_numbers<[1], [1], [0], [0], [0, 0, 1, 0], [], []>} : vector<16x8xf32>, vector<16x8xf32>, vector<16x16xf32> -> vector<16x16xf32>
    %cst_69 = arith.constant 0.353553385 : f32
    %178 = vector.broadcast %cst_69 : f32 to vector<16x16xf32>
    %179 = arith.mulf %177, %178 : vector<16x16xf32>
    %180 = arith.addf %179, %137 : vector<16x16xf32>
    %cst_70 = arith.constant dense<0xFF800000> : vector<16xf32>
    %181 = vector.multi_reduction <maximumf>, %180, %cst_70 [1] : vector<16x16xf32> to vector<16xf32>
    %182 = vector.shape_cast %181 : vector<16xf32> to vector<16x1xf32>
    %183 = vector.broadcast %182 : vector<16x1xf32> to vector<16x16xf32>
    %184 = arith.subf %180, %183 : vector<16x16xf32>
    %185 = math.exp %184 : vector<16x16xf32>
    %cst_71 = arith.constant dense<0.000000e+00> : vector<16xf32>
    %186 = vector.multi_reduction <add>, %185, %cst_71 [1] : vector<16x16xf32> to vector<16xf32>
    %187 = vector.shape_cast %186 : vector<16xf32> to vector<16x1xf32>
    %188 = tpu.reciprocal %187 {approx = true} : vector<16x1xf32> -> vector<16x1xf32>
    %189 = vector.broadcast %188 : vector<16x1xf32> to vector<16x16xf32>
    %190 = arith.mulf %185, %189 : vector<16x16xf32>
    %cst_72 = arith.constant dense<0.000000e+00> : vector<16x8xf32>
    %191 = tpu.matmul %190, %176, %cst_72 {dimension_numbers = #tpu.dot_dimension_numbers<[1], [0], [0], [1], [0, 0, 1, 1], [], []>} : vector<16x16xf32>, vector<16x8xf32>, vector<16x8xf32> -> vector<16x8xf32>
    %192 = vector.extract_strided_slice %126 {offsets = [0, 24], sizes = [16, 8], strides = [1, 1]} : vector<16x32xf32> to vector<16x8xf32>
    %193 = vector.extract_strided_slice %135 {offsets = [0, 24], sizes = [16, 8], strides = [1, 1]} : vector<16x32xf32> to vector<16x8xf32>
    %194 = vector.extract_strided_slice %136 {offsets = [0, 24], sizes = [16, 8], strides = [1, 1]} : vector<16x32xf32> to vector<16x8xf32>
    %cst_73 = arith.constant dense<0.000000e+00> : vector<16x16xf32>
    %195 = tpu.matmul %192, %193, %cst_73 {dimension_numbers = #tpu.dot_dimension_numbers<[1], [1], [0], [0], [0, 0, 1, 0], [], []>} : vector<16x8xf32>, vector<16x8xf32>, vector<16x16xf32> -> vector<16x16xf32>
    %cst_74 = arith.constant 0.353553385 : f32
    %196 = vector.broadcast %cst_74 : f32 to vector<16x16xf32>
    %197 = arith.mulf %195, %196 : vector<16x16xf32>
    %198 = arith.addf %197, %137 : vector<16x16xf32>
    %cst_75 = arith.constant dense<0xFF800000> : vector<16xf32>
    %199 = vector.multi_reduction <maximumf>, %198, %cst_75 [1] : vector<16x16xf32> to vector<16xf32>
    %200 = vector.shape_cast %199 : vector<16xf32> to vector<16x1xf32>
    %201 = vector.broadcast %200 : vector<16x1xf32> to vector<16x16xf32>
    %202 = arith.subf %198, %201 : vector<16x16xf32>
    %203 = math.exp %202 : vector<16x16xf32>
    %cst_76 = arith.constant dense<0.000000e+00> : vector<16xf32>
    %204 = vector.multi_reduction <add>, %203, %cst_76 [1] : vector<16x16xf32> to vector<16xf32>
    %205 = vector.shape_cast %204 : vector<16xf32> to vector<16x1xf32>
    %206 = tpu.reciprocal %205 {approx = true} : vector<16x1xf32> -> vector<16x1xf32>
    %207 = vector.broadcast %206 : vector<16x1xf32> to vector<16x16xf32>
    %208 = arith.mulf %203, %207 : vector<16x16xf32>
    %cst_77 = arith.constant dense<0.000000e+00> : vector<16x8xf32>
    %209 = tpu.matmul %208, %194, %cst_77 {dimension_numbers = #tpu.dot_dimension_numbers<[1], [0], [0], [1], [0, 0, 1, 1], [], []>} : vector<16x16xf32>, vector<16x8xf32>, vector<16x8xf32> -> vector<16x8xf32>
    %210 = tpu.concatenate %155, %173, %191, %209 in 1 : vector<16x8xf32>, vector<16x8xf32>, vector<16x8xf32>, vector<16x8xf32> -> vector<16x32xf32>
    %c0_78 = arith.constant 0 : index
    %c128 = arith.constant 128 : index
    %c0_79 = arith.constant 0 : index
    %211 = vector.load %arg6[%c0_78, %c128, %c0_79] : memref<1x256x96xf32, #tpu.memory_space<vmem>>, vector<1x32x32xf32>
    %212 = vector.shape_cast %211 : vector<1x32x32xf32> to vector<32x32xf32>
    %cst_80 = arith.constant dense<0.000000e+00> : vector<16x32xf32>
    %213 = tpu.matmul %210, %212, %cst_80 {dimension_numbers = #tpu.dot_dimension_numbers<[1], [0], [0], [1], [0, 0, 1, 1], [], []>} : vector<16x32xf32>, vector<32x32xf32>, vector<16x32xf32> -> vector<16x32xf32>
    %c0_81 = arith.constant 0 : index
    %c4 = arith.constant 4 : index
    %c0_82 = arith.constant 0 : index
    %214 = vector.load %arg7[%c0_81, %c4, %c0_82] : memref<1x16x96xf32, #tpu.memory_space<vmem>>, vector<1x1x32xf32>
    %215 = vector.shape_cast %214 : vector<1x1x32xf32> to vector<1x32xf32>
    %216 = vector.broadcast %215 : vector<1x32xf32> to vector<16x32xf32>
    %217 = arith.addf %213, %216 : vector<16x32xf32>
    %218 = arith.addf %119, %217 : vector<16x32xf32>
    %c0_83 = arith.constant 0 : index
    %c9 = arith.constant 9 : index
    %c0_84 = arith.constant 0 : index
    %219 = vector.load %arg7[%c0_83, %c9, %c0_84] : memref<1x16x96xf32, #tpu.memory_space<vmem>>, vector<1x1x32xf32>
    %220 = vector.shape_cast %219 : vector<1x1x32xf32> to vector<1x32xf32>
    %c0_85 = arith.constant 0 : index
    %c10 = arith.constant 10 : index
    %c0_86 = arith.constant 0 : index
    %221 = vector.load %arg7[%c0_85, %c10, %c0_86] : memref<1x16x96xf32, #tpu.memory_space<vmem>>, vector<1x1x32xf32>
    %222 = vector.shape_cast %221 : vector<1x1x32xf32> to vector<1x32xf32>
    %cst_87 = arith.constant dense<0.000000e+00> : vector<16xf32>
    %223 = vector.multi_reduction <add>, %218, %cst_87 [1] : vector<16x32xf32> to vector<16xf32>
    %224 = vector.shape_cast %223 : vector<16xf32> to vector<16x1xf32>
    %cst_88 = arith.constant 3.200000e+01 : f32
    %225 = vector.broadcast %cst_88 : f32 to vector<16x1xf32>
    %226 = arith.divf %224, %225 : vector<16x1xf32>
    %227 = vector.broadcast %226 : vector<16x1xf32> to vector<16x32xf32>
    %228 = arith.subf %218, %227 : vector<16x32xf32>
    %229 = arith.mulf %228, %228 : vector<16x32xf32>
    %cst_89 = arith.constant dense<0.000000e+00> : vector<16xf32>
    %230 = vector.multi_reduction <add>, %229, %cst_89 [1] : vector<16x32xf32> to vector<16xf32>
    %231 = vector.shape_cast %230 : vector<16xf32> to vector<16x1xf32>
    %cst_90 = arith.constant 3.200000e+01 : f32
    %232 = vector.broadcast %cst_90 : f32 to vector<16x1xf32>
    %233 = arith.divf %231, %232 : vector<16x1xf32>
    %cst_91 = arith.constant 9.99999974E-6 : f32
    %234 = vector.broadcast %cst_91 : f32 to vector<16x1xf32>
    %235 = arith.addf %233, %234 : vector<16x1xf32>
    %236 = math.rsqrt %235 : vector<16x1xf32>
    %237 = vector.broadcast %236 : vector<16x1xf32> to vector<16x32xf32>
    %238 = arith.mulf %228, %237 : vector<16x32xf32>
    %239 = vector.broadcast %220 : vector<1x32xf32> to vector<16x32xf32>
    %240 = arith.mulf %238, %239 : vector<16x32xf32>
    %241 = vector.broadcast %222 : vector<1x32xf32> to vector<16x32xf32>
    %242 = arith.addf %240, %241 : vector<16x32xf32>
    %c0_92 = arith.constant 0 : index
    %c160 = arith.constant 160 : index
    %c0_93 = arith.constant 0 : index
    %243 = vector.load %arg6[%c0_92, %c160, %c0_93] : memref<1x256x96xf32, #tpu.memory_space<vmem>>, vector<1x32x64xf32>
    %244 = vector.shape_cast %243 : vector<1x32x64xf32> to vector<32x64xf32>
    %cst_94 = arith.constant dense<0.000000e+00> : vector<16x64xf32>
    %245 = tpu.matmul %242, %244, %cst_94 {dimension_numbers = #tpu.dot_dimension_numbers<[1], [0], [0], [1], [0, 0, 1, 1], [], []>} : vector<16x32xf32>, vector<32x64xf32>, vector<16x64xf32> -> vector<16x64xf32>
    %c0_95 = arith.constant 0 : index
    %c5 = arith.constant 5 : index
    %c0_96 = arith.constant 0 : index
    %246 = vector.load %arg7[%c0_95, %c5, %c0_96] : memref<1x16x96xf32, #tpu.memory_space<vmem>>, vector<1x1x64xf32>
    %247 = vector.shape_cast %246 : vector<1x1x64xf32> to vector<1x64xf32>
    %248 = vector.broadcast %247 : vector<1x64xf32> to vector<16x64xf32>
    %249 = arith.addf %245, %248 : vector<16x64xf32>
    %cst_97 = arith.constant 0.000000e+00 : f32
    %250 = vector.broadcast %cst_97 : f32 to vector<16x64xf32>
    %251 = arith.maximumf %249, %250 : vector<16x64xf32>
    %c0_98 = arith.constant 0 : index
    %c192 = arith.constant 192 : index
    %c0_99 = arith.constant 0 : index
    %252 = vector.load %arg6[%c0_98, %c192, %c0_99] : memref<1x256x96xf32, #tpu.memory_space<vmem>>, vector<1x64x32xf32>
    %253 = vector.shape_cast %252 : vector<1x64x32xf32> to vector<64x32xf32>
    %cst_100 = arith.constant dense<0.000000e+00> : vector<16x32xf32>
    %254 = tpu.matmul %251, %253, %cst_100 {dimension_numbers = #tpu.dot_dimension_numbers<[1], [0], [0], [1], [0, 0, 1, 1], [], []>} : vector<16x64xf32>, vector<64x32xf32>, vector<16x32xf32> -> vector<16x32xf32>
    %c0_101 = arith.constant 0 : index
    %c6 = arith.constant 6 : index
    %c0_102 = arith.constant 0 : index
    %255 = vector.load %arg7[%c0_101, %c6, %c0_102] : memref<1x16x96xf32, #tpu.memory_space<vmem>>, vector<1x1x32xf32>
    %256 = vector.shape_cast %255 : vector<1x1x32xf32> to vector<1x32xf32>
    %257 = vector.broadcast %256 : vector<1x32xf32> to vector<16x32xf32>
    %258 = arith.addf %254, %257 : vector<16x32xf32>
    %259 = arith.addf %242, %258 : vector<16x32xf32>
    %c0_103 = arith.constant 0 : index
    %c11 = arith.constant 11 : index
    %c0_104 = arith.constant 0 : index
    %260 = vector.load %arg7[%c0_103, %c11, %c0_104] : memref<1x16x96xf32, #tpu.memory_space<vmem>>, vector<1x1x32xf32>
    %261 = vector.shape_cast %260 : vector<1x1x32xf32> to vector<1x32xf32>
    %c0_105 = arith.constant 0 : index
    %c12 = arith.constant 12 : index
    %c0_106 = arith.constant 0 : index
    %262 = vector.load %arg7[%c0_105, %c12, %c0_106] : memref<1x16x96xf32, #tpu.memory_space<vmem>>, vector<1x1x32xf32>
    %263 = vector.shape_cast %262 : vector<1x1x32xf32> to vector<1x32xf32>
    %cst_107 = arith.constant dense<0.000000e+00> : vector<16xf32>
    %264 = vector.multi_reduction <add>, %259, %cst_107 [1] : vector<16x32xf32> to vector<16xf32>
    %265 = vector.shape_cast %264 : vector<16xf32> to vector<16x1xf32>
    %cst_108 = arith.constant 3.200000e+01 : f32
    %266 = vector.broadcast %cst_108 : f32 to vector<16x1xf32>
    %267 = arith.divf %265, %266 : vector<16x1xf32>
    %268 = vector.broadcast %267 : vector<16x1xf32> to vector<16x32xf32>
    %269 = arith.subf %259, %268 : vector<16x32xf32>
    %270 = arith.mulf %269, %269 : vector<16x32xf32>
    %cst_109 = arith.constant dense<0.000000e+00> : vector<16xf32>
    %271 = vector.multi_reduction <add>, %270, %cst_109 [1] : vector<16x32xf32> to vector<16xf32>
    %272 = vector.shape_cast %271 : vector<16xf32> to vector<16x1xf32>
    %cst_110 = arith.constant 3.200000e+01 : f32
    %273 = vector.broadcast %cst_110 : f32 to vector<16x1xf32>
    %274 = arith.divf %272, %273 : vector<16x1xf32>
    %cst_111 = arith.constant 9.99999974E-6 : f32
    %275 = vector.broadcast %cst_111 : f32 to vector<16x1xf32>
    %276 = arith.addf %274, %275 : vector<16x1xf32>
    %277 = math.rsqrt %276 : vector<16x1xf32>
    %278 = vector.broadcast %277 : vector<16x1xf32> to vector<16x32xf32>
    %279 = arith.mulf %269, %278 : vector<16x32xf32>
    %280 = vector.broadcast %261 : vector<1x32xf32> to vector<16x32xf32>
    %281 = arith.mulf %279, %280 : vector<16x32xf32>
    %282 = vector.broadcast %263 : vector<1x32xf32> to vector<16x32xf32>
    %283 = arith.addf %281, %282 : vector<16x32xf32>
    %c0_112 = arith.constant 0 : index
    %c0_113 = arith.constant 0 : index
    %284 = vector.load %arg9[%c0_112, %c0_113] : memref<16x32xf32, #tpu.memory_space<vmem>>, vector<16x32xf32>
    tpu.vector_store %arg9[%c0_112, %c0_113], %283 {strides = array<i32>} : memref<16x32xf32, #tpu.memory_space<vmem>>, vector<16x32xf32>,
    %c1_i32 = arith.constant 1 : i32
    %285 = arith.cmpi eq, %arg0, %c1_i32 : i32
    %286 = arith.extui %285 : i1 to i32
    %c0_i32_114 = arith.constant 0 : i32
    %287 = arith.cmpi ne, %286, %c0_i32_114 : i32
    scf.if %287 {
      %c32_115 = arith.constant 32 : index
      %c0_116 = arith.constant 0 : index
      %288 = vector.load %arg5[%c32_115, %c0_116] : memref<88x32xf32, #tpu.memory_space<vmem>>, vector<32x4xf32>
      %c64_117 = arith.constant 64 : index
      %c0_118 = arith.constant 0 : index
      %289 = vector.load %arg5[%c64_117, %c0_118] : memref<88x32xf32, #tpu.memory_space<vmem>>, vector<1x4xf32>
      %c72 = arith.constant 72 : index
      %c0_119 = arith.constant 0 : index
      %290 = vector.load %arg5[%c72, %c0_119] : memref<88x32xf32, #tpu.memory_space<vmem>>, vector<4x4xf32>
      %c80 = arith.constant 80 : index
      %c0_120 = arith.constant 0 : index
      %291 = vector.load %arg5[%c80, %c0_120] : memref<88x32xf32, #tpu.memory_space<vmem>>, vector<1x4xf32>
      %cst_121 = arith.constant dense<0.000000e+00> : vector<16x4xf32>
      %292 = tpu.matmul %283, %288, %cst_121 {dimension_numbers = #tpu.dot_dimension_numbers<[1], [0], [0], [1], [0, 0, 1, 1], [], []>} : vector<16x32xf32>, vector<32x4xf32>, vector<16x4xf32> -> vector<16x4xf32>
      %293 = vector.broadcast %289 : vector<1x4xf32> to vector<16x4xf32>
      %294 = arith.addf %292, %293 : vector<16x4xf32>
      %295 = math.tanh %294 : vector<16x4xf32>
      %cst_122 = arith.constant dense<0.000000e+00> : vector<16x4xf32>
      %296 = tpu.matmul %295, %290, %cst_122 {dimension_numbers = #tpu.dot_dimension_numbers<[1], [0], [0], [1], [0, 0, 1, 1], [], []>} : vector<16x4xf32>, vector<4x4xf32>, vector<16x4xf32> -> vector<16x4xf32>
      %297 = vector.broadcast %291 : vector<1x4xf32> to vector<16x4xf32>
      %298 = arith.addf %296, %297 : vector<16x4xf32>
      %c0_123 = arith.constant 0 : index
      %c0_124 = arith.constant 0 : index
      %299 = vector.load %arg8[%c0_123, %c0_124] : memref<16x4xf32, #tpu.memory_space<vmem>>, vector<16x4xf32>
      tpu.vector_store %arg8[%c0_123, %c0_124], %298 {strides = array<i32>} : memref<16x4xf32, #tpu.memory_space<vmem>>, vector<16x4xf32>,
    } else {
    }
    return
  }
  func.func @transform_0(%arg0: i32) -> (i32, i32) {
    %c0_i32 = arith.constant 0 : i32
    %c0_i32_0 = arith.constant 0 : i32
    %c0_i32_1 = arith.constant 0 : i32
    return %c0_i32, %c0_i32_0 : i32, i32
  }
  func.func @transform_1(%arg0: i32) -> (i32, i32) {
    %c0_i32 = arith.constant 0 : i32
    %c0_i32_0 = arith.constant 0 : i32
    %c0_i32_1 = arith.constant 0 : i32
    return %c0_i32, %c0_i32_0 : i32, i32
  }
  func.func @transform_2(%arg0: i32) -> (i32, i32) {
    %c0_i32 = arith.constant 0 : i32
    %c0_i32_0 = arith.constant 0 : i32
    %c0_i32_1 = arith.constant 0 : i32
    return %c0_i32, %c0_i32_0 : i32, i32
  }
  func.func @transform_3(%arg0: i32) -> (i32, i32) {
    %c0_i32 = arith.constant 0 : i32
    %c0_i32_0 = arith.constant 0 : i32
    %c0_i32_1 = arith.constant 0 : i32
    return %c0_i32, %c0_i32_0 : i32, i32
  }
  func.func @transform_4(%arg0: i32) -> (i32, i32) {
    %c0_i32 = arith.constant 0 : i32
    %c0_i32_0 = arith.constant 0 : i32
    %c0_i32_1 = arith.constant 0 : i32
    return %c0_i32, %c0_i32_0 : i32, i32
  }
  func.func @transform_5(%arg0: i32) -> (i32, i32, i32) {
    %c0_i32 = arith.constant 0 : i32
    %c0_i32_0 = arith.constant 0 : i32
    %c0_i32_1 = arith.constant 0 : i32
    return %arg0, %c0_i32, %c0_i32_0 : i32, i32, i32
  }
  func.func @transform_6(%arg0: i32) -> (i32, i32, i32) {
    %c0_i32 = arith.constant 0 : i32
    %c0_i32_0 = arith.constant 0 : i32
    %c0_i32_1 = arith.constant 0 : i32
    return %arg0, %c0_i32, %c0_i32_0 : i32, i32, i32
  }
  func.func @transform_7(%arg0: i32) -> (i32, i32) {
    %c0_i32 = arith.constant 0 : i32
    %c0_i32_0 = arith.constant 0 : i32
    %c0_i32_1 = arith.constant 0 : i32
    return %c0_i32, %c0_i32_0 : i32, i32
  }
}

</mosaic_0001>

<bundles_post_ra>
// kernel: _lambda_.2
= control target key start
LH: loop header
LB: loop body
LE: loop exit
PB: predicated region body
PF: predicated region fallthrough
CT: control target
= control target key end

     0   :  { %v202_v0 = vmov 0   ;;  %vm63_vm0 = vcmask 64512   ;;  %s262_s0 = inlined_call_operand.vmem [shape: f32[32,1], index: 0, kind: input, shape index: {}]   ;;  %s263_s1 = inlined_call_operand.vmem [shape: f32[16,8], index: 1, kind: input, shape index: {}]   ;;  %s264_s2 = inlined_call_operand.vmem [shape: f32[32,8], index: 2, kind: output, shape index: {}]  }
   0x1   :  { %193 = vset.pattern.permute.xlu1 %v202_v0  ;;  %192 = vset.pattern.permute.xlu0 %v202_v0  ;;  %v12_v1 = vld [vmem:[%s262_s0 + $0x8] sm:$0xff]  ;;  %v11_v2 = vld [vmem:[%s262_s0] sm:$0xff]  ;;  %v14_v3 = vld [vmem:[%s262_s0 + $0x18] sm:$0xff] }
   0x2   :  { %26 = vperm.xlu1 %193, %v12_v1   ;;  %21 = vperm.xlu0 %192, %v11_v2   ;;  %v13_v4 = vld [vmem:[%s262_s0 + $0x10] sm:$0xff]  ;;  %v18_v5 = vld [vmem:[%s263_s1 + $0x8] sm:$0xff]  ;;  %v169_v6 = vld [vmem:[%s263_s1] ss:$0 sm:$0xff] }
   0x3   :  { %181 = vmatprep.subr.mxu0 %v18_v5  ;;  %189 = vmatprep.subr.mxu1 %v18_v5  ;;  %v170_v7 = vld [vmem:[%s263_s1 + $0x1] ss:$0 sm:$0xff]  ;;  %v171_v24 = vld [vmem:[%s263_s1 + $0x2] ss:$0 sm:$0xff] }
   0x4   :  { %182 = vmatpush3.msra.mxu0 %v18_v5  ;;  %190 = vmatpush3.msra.mxu1 %v18_v5 }
   0x6   :  { %36 = vperm.xlu1 %193, %v14_v3   ;;  %31 = vperm.xlu0 %192, %v13_v4  }
  0x81   :  { %v27_v8 = vpop.permute.xlu1 %26  ;;  %v22_v9 = vpop.permute.xlu0 %21 }
  0x82   :  { %v44_v10 = vmul.f32 %v169_v6, %v27_v8  ;;  %v43_v11 = vmul.f32 %v169_v6, %v22_v9 }
  0x84   :  { %v52_v12 = vadd.f32 %v170_v7, %v44_v10  ;;  %v51_v13 = vadd.f32 %v170_v7, %v43_v11 }
  0x85   :  { %v37_v14 = vpop.permute.xlu1 %36  ;;  %v32_v15 = vpop.permute.xlu0 %31 }
  0x86   :  { %194 = vtanh.f32 %v52_v12  ;;  %v46_v16 = vmul.f32 %v169_v6, %v37_v14  ;;  %v45_v17 = vmul.f32 %v169_v6, %v32_v15 }
  0x87   :  { %196 = vtanh.f32 %v51_v13 }
  0x88   :  { %v54_v18 = vadd.f32 %v170_v7, %v46_v16  ;;  %v53_v19 = vadd.f32 %v170_v7, %v45_v17 }
  0x8a   :  { %198 = vtanh.f32 %v54_v18 }
  0x8b   :  { %200 = vtanh.f32 %v53_v19 }
  0x90   :  { %v195_v20 = vpop.eup %194 }
  0x91   :  { %v197_v21 = vpop.eup %196 }
  0x92   :  { %183 = vmatprep.mubr.msk.f32.mxu0 %vm63_vm0, %v197_v21 }
  0x93   :  { %184 = vmatmul.mubr.msk.f32.vlgmr.msra.gmra.mrb[0].mxu0 %vm63_vm0, %v195_v20 }
  0x94   :  { %v199_v22 = vpop.eup %198 }
  0x95   :  { %v201_v23 = vpop.eup %200 }
  0x96   :  { %186 = vmatprep.mubr.msk.f32.mxu1 %vm63_vm0, %v201_v23 }
  0x97   :  { %187 = vmatmul.mubr.msk.f32.vlgmr.msra.gmra.mrb[0].mxu1 %vm63_vm0, %v199_v22 }
 0x166   :  { %v185_v25 = vpop.f32.mrb[0].mxu0 }
 0x167   :  { %v148_v26 = vadd.f32 %v185_v25, %v171_v24  ;;  %v142_v27 = vpop.f32.mrb[1].mxu0 }
 0x168   :  { %v143_v28 = vadd.f32 %v171_v24, %v142_v27 }
 0x169   :  { %162 = vst.msk [vmem:[%s264_s2 + $0x8] sm:$0xff] %vm63_vm0, %v148_v26 }
 0x16a   :  { %161 = vst.msk [vmem:[%s264_s2] sm:$0xff] %vm63_vm0, %v143_v28  ;;  %v188_v29 = vpop.f32.mrb[0].mxu1 }
 0x16b   :  { %v158_v30 = vadd.f32 %v188_v29, %v171_v24  ;;  %v152_v31 = vpop.f32.mrb[1].mxu1 }
 0x16c   :  { %v153_v32 = vadd.f32 %v171_v24, %v152_v31 }
 0x16d   :  { %164 = vst.msk [vmem:[%s264_s2 + $0x18] sm:$0xff] %vm63_vm0, %v158_v30 }
 0x16e   :  { %163 = vst.msk [vmem:[%s264_s2 + $0x10] sm:$0xff] %vm63_vm0, %v153_v32 }

// kernel: _lambda_.3
= control target key start
LH: loop header
LB: loop body
LE: loop exit
PB: predicated region body
PF: predicated region fallthrough
CT: control target
= control target key end

     0   :  { %s3916_s24 = smov 0   ;;  %s4337_s0 = inlined_call_operand.vmem [shape: f32[16,16], index: 0, kind: input, shape index: {}]   ;;  %s4338_s1 = inlined_call_operand.vmem [shape: f32[16,32], index: 1, kind: input, shape index: {}]   ;;  %s4339_s2 = inlined_call_operand.vmem [shape: f32[16,16], index: 2, kind: input, shape index: {}]   ;;  %s4340_s3 = inlined_call_operand.vmem [shape: f32[16,16], index: 3, kind: input, shape index: {}]   ;;  %s4341_s4 = inlined_call_operand.vmem [shape: f32[88,32], index: 4, kind: input, shape index: {}]   ;;  %s4342_s5 = inlined_call_operand.vmem [shape: f32[2,256,96], index: 5, kind: input, shape index: {}]   ;;  %s4343_s6 = inlined_call_operand.vmem [shape: f32[2,16,96], index: 6, kind: input, shape index: {}]   ;;  %s4344_s7 = inlined_call_operand.vmem [shape: f32[16,4], index: 7, kind: output, shape index: {}]  }
   0x1 LB: > { %s3922_s25 = sadd.s32 4294967295, %s3860_s24   ;;  %p3082_p0 = scmp.ge.s32.totalorder %s3860_s24, 1  ;;  %s3860_s24 = sphi %s3916_s24, %s17_s24  }
   0x2   : > { %p242_p1 = scmp.lt.s32.totalorder %s3860_s24, 3 }
   0x4   : > { %p243_p2 = pnand %p3082_p0, %p242_p1 }
   0x5   : > { %p274_p3 = scmp.lt.s32.totalorder (!%p243_p2), %s3922_s25, 1  ;;  %p3087_p4 = scmp.ne.s32.totalorder (!%p243_p2), %s3922_s25, 0 }
   0x6   : > { %246 = sbr.rel (%p243_p2) target bundleno = 7135 (0x1bdf), region = 48 }
   0xd   : > { %s275_s26 = scalar_select %p274_p3, %s3922_s25, 1 }
   0xe   : > { %287 = sbr.rel (%p3087_p4) target bundleno = 239 (0xef), region = 52  ;;  %v288_v0 = vld [vmem:[%s4341_s4] sm:$0xff] (!%p3087_p4)  ;;  %v289_v1 = vld [vmem:[%s4341_s4 + $0x8] sm:$0xff] (!%p3087_p4)  ;;  %vm298_vm0 = vcmask (!%p3087_p4), 130048   ;;  %v3088_v5 = vld [vmem:[%s4341_s4 + $0x18] ss:$0 sm:$0xff] (!%p3087_p4) }
   0xf   : > { %s3176_s27 = sshll.u32 %s275_s26, 8  ;;  %s3177_s28 = sshll.u32 %s275_s26, 4  ;;  %v292_v2 = vld [vmem:[%s4337_s0] sm:$0xff] (!%p3087_p4)  ;;  %v3521_v3 = vpack.c.bf16 (!%p3087_p4), %v289_v1, %v288_v0  ;;  %v293_v4 = vld [vmem:[%s4337_s0 + $0x8] sm:$0xff] (!%p3087_p4)  ;;  %v291_v6 = vld [vmem:[%s4341_s4 + $0x10] sm:$0xff] (!%p3087_p4)  ;;  %vm382_vm1 = vcmask (!%p3087_p4), 261120  }
  0x10   : > { %s3931_s8 = scalar_lea.vmem %s4342_s5, %s3176_s27  ;;  %s3936_s11 = scalar_lea.vmem %s4343_s6, %s3177_s28  ;;  %3305 = vmatprep.mubr.msk.f32.mxu0 (!%p3087_p4), %vm298_vm0, %v292_v2 }
  0x11   : > { %3522 = vmatprep.subr.bf16.mxu0 (!%p3087_p4), %v3521_v3 }
  0x12   : > { %3524 = vmatpush3.bf16.msra.mxu0 (!%p3087_p4), %v3521_v3 }
  0x15   : > { %3306 = vmatmul.mubr.msk.f32.vlgmr.msra.gmra.mrb[0].mxu0 %vm298_vm0, %v293_v4 }
  0xe8   : > { %v3307_v7 = vpop.f32.mrb[0].mxu0 }
  0xe9   : > { %v377_v8 = vadd.f32 %v3307_v7, %v3088_v5  ;;  %v371_v9 = vpop.f32.mrb[1].mxu0 }
  0xea   : > { %v372_v10 = vadd.f32 %v3088_v5, %v371_v9 }
  0xeb   : > { %v381_v11 = vadd.f32 %v377_v8, %v291_v6 }
  0xec   : > { %v380_v12 = vadd.f32 %v372_v10, %v291_v6 }
  0xed   : > { %384 = vst.msk [vmem:[#allocation2 + $0x8] sm:$0xff] %vm382_vm1, %v381_v11 }
  0xee   : > { %383 = vst.msk [vmem:[#allocation2] sm:$0xff] %vm382_vm1, %v380_v12 }
  0xef PF: > { %v387_v13 = vld [vmem:[%s3931_s8] sm:$0xff]  ;;  %v388_v14 = vld [vmem:[%s3931_s8 + $0x8] sm:$0xff]  ;;  %v389_v15 = vld [vmem:[%s3931_s8 + $0x10] sm:$0xff]  ;;  %vm396_vm2 = vcmask 261120   ;;  %vm486_vm3 = vcmask 64512   ;;  %s3862_s26 = smov 120  }
  0xf0   : > { %v3525_v16 = vpack.c.bf16 %v388_v14, %v387_v13  ;;  %v390_v17 = vld [vmem:[%s3931_s8 + $0x18] sm:$0xff]  ;;  %v3091_v21 = vld [vmem:[%s3936_s11] ss:$0 sm:$0xff]  ;;  %s3863_s27 = smov 96   ;;  %s3864_s28 = smov 88   ;;  %vm3990_vm4 = vmpackc.low %vm486_vm3, %vm486_vm3  ;;  %vm574_vm5 = vcmask 130048  }
  0xf1   : > { %v3529_v19 = vpack.c.bf16 %v390_v17, %v389_v15  ;;  %v4009_v39 = vld [vmem:[%s4339_s2 + $0x8] sm:$0xff]  ;;  %v4014_v42 = vld [vmem:[%s4339_s2] sm:$0xff]  ;;  %s3865_s12 = smov 64   ;;  %s3866_s13 = smov 80   ;;  %vm1324_vm6 = vcmask 195584   ;;  %vm2723_vm7 = vcmask 523264  }
  0xf2   : > { %3526 = vmatprep.subr.bf16.mxu1 %v3525_v16  ;;  %s3867_s14 = smov 56   ;;  %s3868_s15 = smov 112  }
  0xf3   : > { %3528 = vmatpush3.bf16.msra.mxu1 %v3525_v16  ;;  %s3869_s16 = smov 72   ;;  %s3870_s17 = smov 104  }
  0xf4   : > { %3530 = vmatprep.subr.bf16.mxu1 %v3529_v19  ;;  %v3965_v20 = vld [vmem:[#allocation2 + $0x8] sm:$0xff]  ;;  %s3871_s18 = smov 48   ;;  %s3872_s19 = smov 8  }
  0xf5   : > { %v3961_v18 = vld [vmem:[#allocation2] sm:$0xff]  ;;  %s3873_s20 = smov 40   ;;  %s3874_s21 = smov 16  }
  0xf6   : > { %3316 = vmatprep.mubr.msk.f32.mxu1 %vm396_vm2, %v3961_v18  ;;  %s3875_s22 = smov 24   ;;  %p3166_p5 = scmp.ne.s32.totalorder %s3922_s25, 1 }
  0xf7   : > { %3532 = vmatpush3.bf16.msra.mxu1 %v3529_v19  ;;  %vm2958_vm8 = vcmask (!%p3166_p5), 1043456   ;;  %vm2951_vm9 = vcmask (!%p3166_p5), 31744  }
  0xfa   : > { %3317 = vmatmul.mubr.msk.f32.vlgmr.msra.gmra.mrb[0].mxu1 %vm396_vm2, %v3965_v20 }
 0x1cd   : > { %v3318_v22 = vpop.f32.mrb[0].mxu1 }
 0x1ce   : > { %v3970_v23 = vadd.f32 %v3318_v22, %v3091_v21  ;;  %v469_v24 = vpop.f32.mrb[1].mxu1 }
 0x1cf   : > { %v3972_v25 = vadd.f32 %v3091_v21, %v469_v24 }
 0x1d1   : > { %684 = vrot.lane.b32.xlu1 %v3972_v25, %s3862_s26  ;;  %3323 = vmatprep.mubr.msk.f32.mxu1 %vm486_vm3, %v3972_v25  ;;  %v3980_v26 = vpack.i.bf16 %v3970_v23, %v3972_v25 }
 0x1d3   : > { %3700 = vrot.lane.b32.xlu0 %v3980_v26, %s3863_s27 }
 0x1d5   : > { %686 = vrot.lane.b32.xlu1 %v3970_v23, %s3862_s26 }
 0x1d7   : > { %3705 = vrot.lane.b32.xlu0 %v3980_v26, %s3864_s28 }
 0x243   : > { %v685_v36 = vpop.permute.xlu1 %684 }
 0x245   : > { %v3701_v27 = vpop.permute.xlu0 %3700 }
 0x246   : > { %v3703_v28 = vunpack.i.h.bf16 %v3701_v27  ;;  %v3702_v29 = vunpack.i.l.bf16 %v3701_v27 }
 0x247   : > { %v687_v37 = vpop.permute.xlu1 %686 }
 0x248   : > { %v3533_v31 = vpack.c.bf16 %v3703_v28, %v3702_v29 }
 0x249   : > { %v3706_v32 = vpop.permute.xlu0 %3705 }
 0x24a   : > { %v3708_v33 = vunpack.i.h.bf16 %v3706_v32  ;;  %v3707_v34 = vunpack.i.l.bf16 %v3706_v32  ;;  %3535 = vmatprep.subr.msk.bf16.mxu1 %vm3990_vm4, %v3533_v31 }
 0x24b   : > { %3538 = vmatpush3.bf16.xpose.msk.msra.mxu1 %vm3990_vm4, %v3533_v31 }
 0x24c   : > { %v3543_v35 = vpack.c.bf16 %v3708_v33, %v3707_v34 }
 0x24e   : > { %3545 = vmatprep.subr.msk.bf16.mxu1 %vm3990_vm4, %v3543_v35 }
 0x252   : > { %3324 = vmatmul.mubr.msk.f32.vlgmr.msra.gmra.mrb[2].mxu1 %vm486_vm3, %v3970_v23 }
 0x253   : > { %3548 = vmatpush3.bf16.xpose.msk.msra.mxu1 %vm3990_vm4, %v3543_v35  ;;  %3337 = vmatprep.mubr.msk.f32.mxu1 %vm486_vm3, %v685_v36 }
 0x25a   : > { %3338 = vmatmul.mubr.msk.f32.vlgmr.msra.gmra.mrb[4].mxu1 %vm486_vm3, %v687_v37 }
 0x325   : > { %v3325_v38 = vpop.f32.mrb[2].mxu1 }
 0x326   : > { %v571_v40 = vmul.f32 0.35355338, %v3325_v38  ;;  %v561_v41 = vpop.f32.mrb[3].mxu1 }
 0x327   : > { %v570_v43 = vmul.f32 0.35355338, %v561_v41 }
 0x328   : > { %v573_v44 = vadd.f32 %v571_v40, %v4009_v39 }
 0x329   : > { %v572_v45 = vadd.f32 %v570_v43, %v4014_v42 }
 0x32a   : > { %v578_v46 = vsel %vm574_vm5, %v573_v44, -inf }
 0x32b   : > { %579 = vmax.xlane.f32.xlu1 %v578_v46  ;;  %v575_v47 = vsel %vm574_vm5, %v572_v45, -inf }
 0x32c   : > { %576 = vmax.xlane.f32.xlu0 %v575_v47 }
 0x32d   : > { %v3339_v48 = vpop.f32.mrb[4].mxu1 }
 0x32e   : > { %v766_v49 = vpop.f32.mrb[5].mxu1  ;;  %v776_v50 = vmul.f32 0.35355338, %v3339_v48 }
 0x32f   : > { %v775_v51 = vmul.f32 0.35355338, %v766_v49 }
 0x330   : > { %v778_v54 = vadd.f32 %v776_v50, %v4009_v39 }
 0x331   : > { %v777_v52 = vadd.f32 %v775_v51, %v4014_v42 }
 0x332   : > { %v782_v55 = vsel %vm574_vm5, %v778_v54, -inf }
 0x333   : > { %v779_v53 = vsel %vm574_vm5, %v777_v52, -inf }
 0x334   : > { %780 = vmax.xlane.f32.xlu0 %v779_v53 }
 0x338   : > { %783 = vmax.xlane.f32.xlu0 %v782_v55 }
 0x33c   : > { %3710 = vrot.lane.b32.xlu1 %v3980_v26, %s3865_s12 }
 0x3b8   : > { %v580_v56 = vpop.xlane.xlu1 %579 }
 0x3b9   : > { %v582_v57 = vsub.f32 %v573_v44, %v580_v56  ;;  %v577_v58 = vpop.xlane.xlu0 %576 }
 0x3ba   : > { %v581_v59 = vsub.f32 %v572_v45, %v577_v58 }
 0x3bb   : > { %v585_v60 = vmul.f32 1.442695, %v582_v57 }
 0x3bc   : > { %v583_v61 = vmul.f32 1.442695, %v581_v59  ;;  %v3711_v62 = vpop.permute.xlu1 %3710 }
 0x3bd   : > { %3774 = vpow2.f32 %v585_v60  ;;  %v3713_v63 = vunpack.i.h.bf16 %v3711_v62  ;;  %v3712_v0 = vunpack.i.l.bf16 %v3711_v62 }
 0x3be   : > { %3776 = vpow2.f32 %v583_v61 }
 0x3bf   : > { %v3539_v1 = vpack.c.bf16 %v3713_v63, %v3712_v0 }
 0x3c1   : > { %3540 = vmatprep.subr.bf16.mxu0 %v3539_v1  ;;  %v781_v2 = vpop.xlane.xlu0 %780 }
 0x3c2   : > { %3542 = vmatpush3.bf16.msra.mxu0 %v3539_v1  ;;  %v785_v12 = vsub.f32 %v777_v52, %v781_v2 }
 0x3c4   : > { %v787_v13 = vmul.f32 1.442695, %v785_v12 }
 0x3c5   : > { %v784_v3 = vpop.xlane.xlu0 %783 }
 0x3c6   : > { %v786_v4 = vsub.f32 %v778_v54, %v784_v3 }
 0x3c7   : > { %v3775_v5 = vpop.eup %3774 }
 0x3c8   : > { %v3777_v6 = vpop.eup %3776  ;;  %v789_v7 = vmul.f32 1.442695, %v786_v4  ;;  %v590_v8 = vsel %vm574_vm5, %v3775_v5, 0.0 }
 0x3c9   : > { %591 = vadd.xlane.f32.xlu0 %v590_v8  ;;  %v587_v9 = vsel %vm574_vm5, %v3777_v6, 0.0 }
 0x3ca   : > { %3778 = vpow2.f32 %v789_v7  ;;  %588 = vadd.xlane.f32.xlu1 %v587_v9 }
 0x3cb   : > { %3780 = vpow2.f32 %v787_v13 }
 0x3d4   : > { %v3779_v10 = vpop.eup %3778 }
 0x3d5   : > { %v794_v11 = vsel %vm574_vm5, %v3779_v10, 0.0  ;;  %v3781_v14 = vpop.eup %3780 }
 0x3d6   : > { %795 = vadd.xlane.f32.xlu0 %v794_v11  ;;  %v791_v15 = vsel %vm574_vm5, %v3781_v14, 0.0 }
 0x3db   : > { %3720 = vrot.lane.b32.xlu1 %v3980_v26, %s3866_s13 }
 0x3ec   : > { %3715 = vrot.lane.b32.xlu0 %v3980_v26, %s3867_s14 }
 0x3f0   : > { %890 = vrot.lane.b32.xlu0 %v3970_v23, %s3868_s15 }
 0x3ff   : > { %792 = vadd.xlane.f32.xlu1 %v791_v15 }
 0x410   : > { %888 = vrot.lane.b32.xlu1 %v3972_v25, %s3868_s15 }
 0x456   : > { %v592_v16 = vpop.xlane.xlu0 %591 }
 0x457   : > { %3782 = vrcp.f32 %v592_v16  ;;  %v589_v17 = vpop.xlane.xlu1 %588 }
 0x458   : > { %3784 = vrcp.f32 %v589_v17 }
 0x45b   : > { %v3721_v28 = vpop.permute.xlu1 %3720 }
 0x45c   : > { %v3723_v31 = vunpack.i.h.bf16 %v3721_v28  ;;  %v3722_v32 = vunpack.i.l.bf16 %v3721_v28 }
 0x45e   : > { %v3553_v36 = vpack.c.bf16 %v3723_v31, %v3722_v32 }
 0x461   : > { %v3783_v19 = vpop.eup %3782 }
 0x462   : > { %v3785_v21 = vpop.eup %3784  ;;  %v596_v27 = vmul.f32 %v3783_v19, %v3775_v5 }
 0x463   : > { %v796_v22 = vpop.xlane.xlu0 %795  ;;  %v595_v24 = vmul.f32 %v3785_v21, %v3777_v6 }
 0x464   : > { %3786 = vrcp.f32 %v796_v22 }
 0x465   : > { %3330 = vmatprep.mubr.msk.f32.mxu0 %vm574_vm5, %v595_v24 }
 0x466   : > { %3331 = vmatmul.mubr.msk.f32.vlgmr.msra.gmra.mrb[0].mxu0 %vm574_vm5, %v596_v27 }
 0x467   : > { %v3716_v29 = vpop.permute.xlu0 %3715 }
 0x468   : > { %v3718_v33 = vunpack.i.h.bf16 %v3716_v29  ;;  %v3717_v34 = vunpack.i.l.bf16 %v3716_v29 }
 0x46a   : > { %v3549_v35 = vpack.c.bf16 %v3718_v33, %v3717_v34 }
 0x46b   : > { %v891_v45 = vpop.permute.xlu0 %890 }
 0x46c   : > { %3550 = vmatprep.subr.bf16.mxu0 %v3549_v35 }
 0x46d   : > { %3552 = vmatpush3.bf16.msra.mxu0 %v3549_v35 }
 0x46e   : > { %3555 = vmatprep.subr.msk.bf16.mxu0 %vm3990_vm4, %v3553_v36  ;;  %v3787_v38 = vpop.eup %3786 }
 0x46f   : > { %v800_v43 = vmul.f32 %v3787_v38, %v3779_v10 }
 0x48c   : > { %v793_v37 = vpop.xlane.xlu1 %792 }
 0x48d   : > { %3788 = vrcp.f32 %v793_v37 }
 0x490   : > { %v889_v44 = vpop.permute.xlu1 %888 }
 0x497   : > { %v3789_v40 = vpop.eup %3788 }
 0x498   : > { %v799_v41 = vmul.f32 %v3789_v40, %v3781_v14 }
 0x49a   : > { %3344 = vmatprep.mubr.msk.f32.mxu0 %vm574_vm5, %v799_v41 }
 0x49b   : > { %3345 = vmatmul.mubr.msk.f32.vlgmr.msra.gmra.mrb[2].mxu0 %vm574_vm5, %v800_v43 }
 0x49c   : > { %3558 = vmatpush3.bf16.xpose.msk.msra.mxu0 %vm3990_vm4, %v3553_v36  ;;  %3351 = vmatprep.mubr.msk.f32.mxu0 %vm486_vm3, %v889_v44 }
 0x4a3   : > { %3352 = vmatmul.mubr.msk.f32.vlgmr.msra.gmra.mrb[4].mxu0 %vm486_vm3, %v891_v45 }
 0x539   : > { %v4046_v46 = vpop.f32.mrb[0].mxu0 }
 0x53a   : > { %v4048_v47 = vpop.f32.mrb[1].mxu0 }
 0x56e   : > { %v4050_v48 = vpop.f32.mrb[2].mxu0 }
 0x56f   : > { %v4052_v49 = vpop.f32.mrb[3].mxu0 }
 0x576   : > { %v3353_v50 = vpop.f32.mrb[4].mxu0 }
 0x577   : > { %v980_v51 = vmul.f32 0.35355338, %v3353_v50  ;;  %v970_v52 = vpop.f32.mrb[5].mxu0 }
 0x578   : > { %v979_v53 = vmul.f32 0.35355338, %v970_v52 }
 0x579   : > { %v982_v54 = vadd.f32 %v980_v51, %v4009_v39 }
 0x57a   : > { %v981_v55 = vadd.f32 %v979_v53, %v4014_v42 }
 0x57b   : > { %v986_v56 = vsel %vm574_vm5, %v982_v54, -inf }
 0x57c   : > { %987 = vmax.xlane.f32.xlu0 %v986_v56  ;;  %v983_v57 = vsel %vm574_vm5, %v981_v55, -inf  ;;  %v1328_v56 = vld [vmem:[%s3931_s8 + $0x28] sm:$0xff] }
 0x57d   : > { %984 = vmax.xlane.f32.xlu1 %v983_v57  ;;  %v1329_v57 = vld [vmem:[%s3931_s8 + $0x30] sm:$0xff] }
 0x609   : > { %v988_v58 = vpop.xlane.xlu0 %987 }
 0x60a   : > { %v990_v59 = vsub.f32 %v982_v54, %v988_v58  ;;  %v985_v60 = vpop.xlane.xlu1 %984 }
 0x60b   : > { %v989_v61 = vsub.f32 %v981_v55, %v985_v60  ;;  %v1327_v55 = vld [vmem:[%s3931_s8 + $0x20] sm:$0xff] }
 0x60c   : > { %v993_v62 = vmul.f32 1.442695, %v990_v59  ;;  %v3573_v58 = vpack.c.bf16 %v1328_v56, %v1327_v55  ;;  %v1330_v59 = vld [vmem:[%s3931_s8 + $0x38] sm:$0xff] }
 0x60d   : > { %v991_v63 = vmul.f32 1.442695, %v989_v61  ;;  %v3577_v60 = vpack.c.bf16 %v1330_v59, %v1329_v57 }
 0x60e   : > { %3790 = vpow2.f32 %v993_v62 }
 0x60f   : > { %3792 = vpow2.f32 %v991_v63 }
 0x618   : > { %v3791_v0 = vpop.eup %3790 }
 0x619   : > { %v3793_v1 = vpop.eup %3792  ;;  %v998_v2 = vsel %vm574_vm5, %v3791_v0, 0.0 }
 0x61a   : > { %999 = vadd.xlane.f32.xlu1 %v998_v2  ;;  %v995_v3 = vsel %vm574_vm5, %v3793_v1, 0.0 }
 0x61b   : > { %996 = vadd.xlane.f32.xlu0 %v995_v3 }
 0x62b   : > { %3730 = vrot.lane.b32.xlu1 %v3980_v26, %s3869_s16 }
 0x62f   : > { %1092 = vrot.lane.b32.xlu1 %v3972_v25, %s3870_s17 }
 0x631   : > { %3725 = vrot.lane.b32.xlu0 %v3980_v26, %s3871_s18 }
 0x635   : > { %1094 = vrot.lane.b32.xlu0 %v3970_v23, %s3870_s17 }
 0x6a7   : > { %v1000_v4 = vpop.xlane.xlu1 %999 }
 0x6a8   : > { %3794 = vrcp.f32 %v1000_v4  ;;  %v997_v5 = vpop.xlane.xlu0 %996 }
 0x6a9   : > { %3796 = vrcp.f32 %v997_v5 }
 0x6ab   : > { %v3731_v6 = vpop.permute.xlu1 %3730 }
 0x6ac   : > { %v3726_v7 = vpop.permute.xlu0 %3725  ;;  %v3733_v8 = vunpack.i.h.bf16 %v3731_v6  ;;  %v3732_v9 = vunpack.i.l.bf16 %v3731_v6 }
 0x6ad   : > { %v3728_v10 = vunpack.i.h.bf16 %v3726_v7  ;;  %v3727_v11 = vunpack.i.l.bf16 %v3726_v7 }
 0x6ae   : > { %v3563_v13 = vpack.c.bf16 %v3733_v8, %v3732_v9 }
 0x6af   : > { %v3559_v12 = vpack.c.bf16 %v3728_v10, %v3727_v11  ;;  %v1093_v16 = vpop.permute.xlu1 %1092  ;;  %v3118_v11 = vld [vmem:[%s3936_s11 + $0x1] ss:$0 sm:$0xff] }
 0x6b0   : > { %v1095_v17 = vpop.permute.xlu0 %1094 }
 0x6b1   : > { %3560 = vmatprep.subr.bf16.mxu1 %v3559_v12 }
 0x6b2   : > { %v3795_v25 = vpop.eup %3794  ;;  %3562 = vmatpush3.bf16.msra.mxu1 %v3559_v12 }
 0x6b3   : > { %v3797_v14 = vpop.eup %3796  ;;  %3565 = vmatprep.subr.msk.bf16.mxu1 %vm3990_vm4, %v3563_v13  ;;  %v1004_v15 = vmul.f32 %v3795_v25, %v3791_v0 }
 0x6b4   : > { %v1003_v23 = vmul.f32 %v3797_v14, %v3793_v1 }
 0x6b6   : > { %3358 = vmatprep.mubr.msk.f32.mxu1 %vm574_vm5, %v1003_v23 }
 0x6b7   : > { %3359 = vmatmul.mubr.msk.f32.vlgmr.msra.gmra.mrb[6].mxu1 %vm574_vm5, %v1004_v15 }
 0x6b8   : > { %3365 = vmatprep.mubr.msk.f32.mxu1 %vm486_vm3, %v1093_v16 }
 0x6bb   : > { %3568 = vmatpush3.bf16.xpose.msk.msra.mxu1 %vm3990_vm4, %v3563_v13 }
 0x6c2   : > { %3366 = vmatmul.mubr.msk.f32.vlgmr.msra.gmra.mrb[8].mxu1 %vm486_vm3, %v1095_v17 }
 0x78a   : > { %v3360_v19 = vpop.f32.mrb[6].mxu1 }
 0x78b   : > { %v1083_v21 = vpop.f32.mrb[7].mxu1 }
 0x795   : > { %v3367_v22 = vpop.f32.mrb[8].mxu1 }
 0x796   : > { %v1184_v24 = vmul.f32 0.35355338, %v3367_v22  ;;  %v1174_v27 = vpop.f32.mrb[9].mxu1 }
 0x797   : > { %v1183_v28 = vmul.f32 0.35355338, %v1174_v27 }
 0x798   : > { %v1186_v29 = vadd.f32 %v1184_v24, %v4009_v39 }
 0x799   : > { %v1185_v31 = vadd.f32 %v1183_v28, %v4014_v42 }
 0x79a   : > { %v1190_v32 = vsel %vm574_vm5, %v1186_v29, -inf }
 0x79b   : > { %1191 = vmax.xlane.f32.xlu0 %v1190_v32  ;;  %v1187_v33 = vsel %vm574_vm5, %v1185_v31, -inf }
 0x79c   : > { %1188 = vmax.xlane.f32.xlu1 %v1187_v33  ;;  %v1554_v33 = vld [vmem:[%s3931_s8 + $0x70] sm:$0xff] }
 0x828   : > { %v1192_v34 = vpop.xlane.xlu0 %1191 }
 0x829   : > { %v1194_v35 = vsub.f32 %v1186_v29, %v1192_v34  ;;  %v1189_v36 = vpop.xlane.xlu1 %1188  ;;  %v1552_v29 = vld [vmem:[%s3931_s8 + $0x60] sm:$0xff]  ;;  %v1555_v34 = vld [vmem:[%s3931_s8 + $0x78] sm:$0xff] }
 0x82a   : > { %v1193_v37 = vsub.f32 %v1185_v31, %v1189_v36  ;;  %v1553_v31 = vld [vmem:[%s3931_s8 + $0x68] sm:$0xff]  ;;  %v1550_v36 = vld [vmem:[%s4338_s1] sm:$0xff] }
 0x82b   : > { %v1197_v38 = vmul.f32 1.442695, %v1194_v35  ;;  %v3589_v32 = vpack.c.bf16 %v1553_v31, %v1552_v29  ;;  %v3593_v35 = vpack.c.bf16 %v1555_v34, %v1554_v33 }
 0x82c   : > { %v1195_v40 = vmul.f32 1.442695, %v1193_v37  ;;  %v1551_v37 = vld [vmem:[%s4338_s1 + $0x8] sm:$0xff] }
 0x82d   : > { %3798 = vpow2.f32 %v1197_v38  ;;  %v1460_v38 = vld [vmem:[%s3931_s8 + $0x40] sm:$0xff] }
 0x82e   : > { %3800 = vpow2.f32 %v1195_v40  ;;  %v1461_v40 = vld [vmem:[%s3931_s8 + $0x48] sm:$0xff] }
 0x837   : > { %v3799_v41 = vpop.eup %3798 }
 0x838   : > { %v3801_v43 = vpop.eup %3800  ;;  %v1202_v39 = vsel %vm574_vm5, %v3799_v41, 0.0 }
 0x839   : > { %1203 = vadd.xlane.f32.xlu1 %v1202_v39  ;;  %v1199_v42 = vsel %vm574_vm5, %v3801_v43, 0.0  ;;  %v1463_v39 = vld [vmem:[%s3931_s8 + $0x58] sm:$0xff] }
 0x83a   : > { %1200 = vadd.xlane.f32.xlu0 %v1199_v42 }
 0x84a   : > { %1298 = vrot.lane.b32.xlu1 %v4052_v49, %s3872_s19 }
 0x84e   : > { %1300 = vrot.lane.b32.xlu1 %v4050_v48, %s3872_s19 }
 0x850   : > { %3735 = vrot.lane.b32.xlu0 %v3980_v26, %s3873_s20 }
 0x852   : > { %1308 = vrot.lane.b32.xlu1 %v3360_v19, %s3874_s21 }
 0x854   : > { %1306 = vrot.lane.b32.xlu0 %v1083_v21, %s3874_s21 }
 0x8c6   : > { %v1204_v44 = vpop.xlane.xlu1 %1203 }
 0x8c7   : > { %3802 = vrcp.f32 %v1204_v44  ;;  %v1201_v45 = vpop.xlane.xlu0 %1200 }
 0x8c8   : > { %3804 = vrcp.f32 %v1201_v45 }
 0x8ca   : > { %v1299_v63 = vpop.permute.xlu1 %1298 }
 0x8cb   : > { %v3736_v50 = vpop.permute.xlu0 %3735  ;;  %v1320_v3 = vsel %vm486_vm3, %v4048_v47, %v1299_v63 }
 0x8cc   : > { %v3738_v49 = vunpack.i.h.bf16 %v3736_v50  ;;  %v3737_v51 = vunpack.i.l.bf16 %v3736_v50 }
 0x8ce   : > { %v3569_v48 = vpack.c.bf16 %v3738_v49, %v3737_v51  ;;  %v1301_v0 = vpop.permute.xlu1 %1300 }
 0x8cf   : > { %v1307_v2 = vpop.permute.xlu0 %1306  ;;  %v1321_v5 = vsel %vm486_vm3, %v4046_v46, %v1301_v0 }
 0x8d0   : > { %3570 = vmatprep.subr.bf16.mxu0 %v3569_v48  ;;  %v1322_v6 = vsel %vm574_vm5, %v1320_v3, %v1307_v2 }
 0x8d1   : > { %v3803_v52 = vpop.eup %3802  ;;  %3572 = vmatpush3.bf16.msra.mxu0 %v3569_v48 }
 0x8d2   : > { %v3805_v26 = vpop.eup %3804  ;;  %v1208_v54 = vmul.f32 %v3803_v52, %v3799_v41  ;;  %3574 = vmatprep.subr.bf16.mxu0 %v3573_v58  ;;  %v1309_v1 = vpop.permute.xlu1 %1308  ;;  %v3581_v41 = vpack.c.bf16 %v1461_v40, %v1460_v38 }
 0x8d3   : > { %v1207_v53 = vmul.f32 %v3805_v26, %v3801_v43  ;;  %v1323_v8 = vsel %vm574_vm5, %v1321_v5, %v1309_v1  ;;  %v1462_v43 = vld [vmem:[%s3931_s8 + $0x50] sm:$0xff]  ;;  %v3121_v26 = vld [vmem:[%s3936_s11 + $0x7] ss:$0 sm:$0xff] }
 0x8d4   : > { %3582 = vmatprep.subr.bf16.mxu1 %v3581_v41  ;;  %v3585_v42 = vpack.c.bf16 %v1463_v39, %v1462_v43 }
 0x8d5   : > { %3372 = vmatprep.mubr.msk.f32.mxu0 %vm574_vm5, %v1207_v53  ;;  %3584 = vmatpush3.bf16.msra.mxu1 %v3581_v41 }
 0x8d6   : > { %3373 = vmatmul.mubr.msk.f32.vlgmr.msra.gmra.mrb[6].mxu0 %vm574_vm5, %v1208_v54  ;;  %3586 = vmatprep.subr.bf16.mxu1 %v3585_v42  ;;  %v3122_v54 = vld [vmem:[%s3936_s11 + $0x8] ss:$0 sm:$0xff] }
 0x8d7   : > { %3576 = vmatpush3.bf16.msra.mxu0 %v3573_v58 }
 0x8d8   : > { %3578 = vmatprep.subr.bf16.mxu0 %v3577_v60 }
 0x8d9   : > { %3588 = vmatpush3.bf16.msra.mxu1 %v3585_v42 }
 0x8db   : > { %3580 = vmatpush3.bf16.msra.mxu0 %v3577_v60 }
 0x8dc   : > { %3590 = vmatprep.subr.bf16.mxu0 %v3589_v32 }
 0x9a9   : > { %v3374_v61 = vpop.f32.mrb[6].mxu0 }
 0x9aa   : > { %1316 = vrot.lane.b32.xlu1 %v3374_v61, %s3875_s22  ;;  %v1287_v62 = vpop.f32.mrb[7].mxu0  ;;  %v3126_v61 = vld [vmem:[%s3936_s11 + $0x3] ss:$0 sm:$0xff] }
 0x9ab   : > { %1314 = vrot.lane.b32.xlu0 %v1287_v62, %s3875_s22 }
 0xa1c   : > { %v1317_v4 = vpop.permute.xlu1 %1316 }
 0xa1d   : > { %v1315_v7 = vpop.permute.xlu0 %1314  ;;  %v1326_v10 = vsel %vm1324_vm6, %v1323_v8, %v1317_v4  ;;  %v3123_v8 = vld [vmem:[%s3936_s11 + $0x2] ss:$0 sm:$0xff] }
 0xa1e   : > { %v1325_v9 = vsel %vm1324_vm6, %v1322_v6, %v1315_v7 }
 0xa1f   : > { %3383 = vmatprep.mubr.msk.f32.mxu0 %vm396_vm2, %v1325_v9 }
 0xa20   : > { %3384 = vmatmul.mubr.msk.f32.vlgmr.msra.gmra.mrb[8].mxu0 %vm396_vm2, %v1326_v10 }
 0xa21   : > { %3592 = vmatpush3.bf16.msra.mxu0 %v3589_v32  ;;  %3405 = vmatprep.mubr.msk.f32.mxu0 %vm396_vm2, %v1550_v36 }
 0xa22   : > { %3594 = vmatprep.subr.bf16.mxu0 %v3593_v35 }
 0xa25   : > { %3596 = vmatpush3.bf16.msra.mxu0 %v3593_v35 }
 0xa28   : > { %3406 = vmatmul.mubr.msk.f32.vlgmr.msra.gmra.mrb[10].mxu0 %vm396_vm2, %v1551_v37 }
 0xaf3   : > { %v3385_v12 = vpop.f32.mrb[8].mxu0 }
 0xaf4   : > { %v1414_v47 = vadd.f32 %v3385_v12, %v3118_v11  ;;  %v1408_v13 = vpop.f32.mrb[9].mxu0 }
 0xaf5   : > { %v1409_v25 = vadd.f32 %v3118_v11, %v1408_v13 }
 0xaf6   : > { %v1418_v46 = vadd.f32 %v1414_v47, %v3965_v20 }
 0xaf7   : > { %v1417_v14 = vadd.f32 %v1409_v25, %v3961_v18 }
 0xaf8   : > { %v1424_v23 = vsel %vm396_vm2, %v1418_v46, 0.0 }
 0xaf9   : > { %1425 = vadd.xlane.f32.xlu1 %v1424_v23  ;;  %v1421_v15 = vsel %vm396_vm2, %v1417_v14, 0.0 }
 0xafa   : > { %1422 = vadd.xlane.f32.xlu0 %v1421_v15  ;;  %v4175_v15 = vld [vmem:[%s4340_s3] sm:$0xff] }
 0xafb   : > { %v3407_v62 = vpop.f32.mrb[10].mxu0 }
 0xafc   : > { %v1639_v63 = vadd.f32 %v3407_v62, %v3126_v61  ;;  %v1633_v0 = vpop.f32.mrb[11].mxu0 }
 0xafd   : > { %v1634_v1 = vadd.f32 %v3126_v61, %v1633_v0 }
 0xaff   : > { %v4140_v2 = vpack.i.bf16 %v1639_v63, %v1634_v1  ;;  %v3597_v3 = vpack.c.bf16 %v1639_v63, %v1634_v1 }
 0xb01   : > { %3599 = vmatprep.subr.msk.bf16.mxu1 %vm3990_vm4, %v3597_v3 }
 0xb0a   : > { %3740 = vrot.lane.b32.xlu1 %v4140_v2, %s3862_s26 }
 0xb86   : > { %v1426_v16 = vpop.xlane.xlu1 %1425 }
 0xb87   : > { %v1429_v17 = vmul.f32 0.03125, %v1426_v16  ;;  %v1423_v19 = vpop.xlane.xlu0 %1422 }
 0xb88   : > { %v1428_v21 = vmul.f32 0.03125, %v1423_v19 }
 0xb89   : > { %v1431_v22 = vsub.f32 %v1418_v46, %v1429_v17  ;;  %v4170_v46 = vld [vmem:[%s4340_s3 + $0x8] sm:$0xff] }
 0xb8a   : > { %v1430_v24 = vsub.f32 %v1417_v14, %v1428_v21  ;;  %v3741_v4 = vpop.permute.xlu1 %3740 }
 0xb8b   : > { %v1433_v18 = vmul.f32 %v1431_v22, %v1431_v22  ;;  %v3743_v5 = vunpack.i.h.bf16 %v3741_v4  ;;  %v3742_v6 = vunpack.i.l.bf16 %v3741_v4 }
 0xb8c   : > { %v1432_v27 = vmul.f32 %v1430_v24, %v1430_v24 }
 0xb8d   : > { %v1437_v28 = vsel %vm396_vm2, %v1433_v18, 0.0  ;;  %v3607_v7 = vpack.c.bf16 %v3743_v5, %v3742_v6 }
 0xb8e   : > { %v1434_v20 = vsel %vm396_vm2, %v1432_v27, 0.0 }
 0xb8f   : > { %1435 = vadd.xlane.f32.xlu0 %v1434_v20 }
 0xb93   : > { %1438 = vadd.xlane.f32.xlu0 %v1437_v28 }
 0xc1c   : > { %v1436_v44 = vpop.xlane.xlu0 %1435 }
 0xc1d   : > { %v1440_v45 = vmul.f32 0.03125, %v1436_v44 }
 0xc1f   : > { %v1442_v50 = vadd.f32 1e-05, %v1440_v45 }
 0xc20   : > { %v1439_v49 = vpop.xlane.xlu0 %1438 }
 0xc21   : > { %3806 = vrsqrt.f32 %v1442_v50  ;;  %v1441_v51 = vmul.f32 0.03125, %v1439_v49 }
 0xc23   : > { %v1443_v48 = vadd.f32 1e-05, %v1441_v51 }
 0xc25   : > { %3808 = vrsqrt.f32 %v1443_v48 }
 0xc2b   : > { %v3807_v52 = vpop.eup %3806 }
 0xc2c   : > { %v1446_v53 = vmul.f32 %v3807_v52, %v1430_v24 }
 0xc2e   : > { %v1452_v55 = vmul.f32 %v3121_v26, %v1446_v53 }
 0xc2f   : > { %v3809_v56 = vpop.eup %3808 }
 0xc30   : > { %v1447_v57 = vmul.f32 %v3809_v56, %v1431_v22  ;;  %v4131_v58 = vadd.f32 %v3122_v54, %v1452_v55 }
 0xc32   : > { %v1453_v59 = vmul.f32 %v3121_v26, %v1447_v57  ;;  %3394 = vmatprep.mubr.msk.f32.mxu1 %vm396_vm2, %v4131_v58 }
 0xc34   : > { %v4135_v60 = vadd.f32 %v3122_v54, %v1453_v59 }
 0xc36   : > { %3395 = vmatmul.mubr.msk.f32.vlgmr.msra.gmra.mrb[10].mxu1 %vm396_vm2, %v4135_v60 }
 0xc37   : > { %3602 = vmatpush3.bf16.xpose.msk.msra.mxu1 %vm3990_vm4, %v3597_v3 }
 0xc38   : > { %3609 = vmatprep.subr.msk.bf16.mxu1 %vm3990_vm4, %v3607_v7 }
 0xd09   : > { %v3396_v9 = vpop.f32.mrb[10].mxu1 }
 0xd0a   : > { %v4151_v10 = vadd.f32 %v3396_v9, %v3123_v8  ;;  %v1541_v11 = vpop.f32.mrb[11].mxu1 }
 0xd0b   : > { %v4153_v12 = vadd.f32 %v3123_v8, %v1541_v11 }
 0xd0c   : > { %1846 = vrot.lane.b32.xlu1 %v4151_v10, %s3862_s26 }
 0xd0d   : > { %1844 = vrot.lane.b32.xlu0 %v4153_v12, %s3862_s26  ;;  %3412 = vmatprep.mubr.msk.f32.mxu1 %vm486_vm3, %v4153_v12 }
 0xd0e   : > { %3413 = vmatmul.mubr.msk.f32.vlgmr.msra.gmra.mrb[12].mxu1 %vm486_vm3, %v4151_v10 }
 0xd0f   : > { %3612 = vmatpush3.bf16.xpose.msk.msra.mxu1 %vm3990_vm4, %v3607_v7 }
 0xd7e   : > { %v1847_v13 = vpop.permute.xlu1 %1846 }
 0xd7f   : > { %v1845_v47 = vpop.permute.xlu0 %1844 }
 0xd80   : > { %3426 = vmatprep.mubr.msk.f32.mxu1 %vm486_vm3, %v1845_v47 }
 0xd81   : > { %3427 = vmatmul.mubr.msk.f32.vlgmr.msra.gmra.mrb[14].mxu1 %vm486_vm3, %v1847_v13 }
 0xde1   : > { %v3414_v25 = vpop.f32.mrb[12].mxu1 }
 0xde2   : > { %v1732_v14 = vmul.f32 0.35355338, %v3414_v25  ;;  %v1722_v23 = vpop.f32.mrb[13].mxu1 }
 0xde3   : > { %v1731_v16 = vmul.f32 0.35355338, %v1722_v23 }
 0xde4   : > { %v1734_v17 = vadd.f32 %v1732_v14, %v4170_v46 }
 0xde5   : > { %v1733_v19 = vadd.f32 %v1731_v16, %v4175_v15 }
 0xde6   : > { %v1738_v21 = vsel %vm574_vm5, %v1734_v17, -inf }
 0xde7   : > { %1739 = vmax.xlane.f32.xlu0 %v1738_v21  ;;  %v1735_v22 = vsel %vm574_vm5, %v1733_v19, -inf }
 0xde8   : > { %1736 = vmax.xlane.f32.xlu1 %v1735_v22 }
 0xe54   : > { %v3428_v24 = vpop.f32.mrb[14].mxu1 }
 0xe55   : > { %v1936_v27 = vmul.f32 0.35355338, %v3428_v24  ;;  %v1926_v20 = vpop.f32.mrb[15].mxu1 }
 0xe56   : > { %v1935_v18 = vmul.f32 0.35355338, %v1926_v20 }
 0xe57   : > { %v1938_v28 = vadd.f32 %v1936_v27, %v4170_v46 }
 0xe58   : > { %v1937_v29 = vadd.f32 %v1935_v18, %v4175_v15 }
 0xe59   : > { %v1942_v31 = vsel %vm574_vm5, %v1938_v28, -inf }
 0xe5a   : > { %1943 = vmax.xlane.f32.xlu1 %v1942_v31  ;;  %v1939_v32 = vsel %vm574_vm5, %v1937_v29, -inf }
 0xe5b   : > { %1940 = vmax.xlane.f32.xlu0 %v1939_v32 }
 0xe74   : > { %v1740_v33 = vpop.xlane.xlu0 %1739 }
 0xe75   : > { %v1742_v34 = vsub.f32 %v1734_v17, %v1740_v33  ;;  %v1737_v35 = vpop.xlane.xlu1 %1736 }
 0xe76   : > { %v1741_v36 = vsub.f32 %v1733_v19, %v1737_v35 }
 0xe77   : > { %v1745_v37 = vmul.f32 1.442695, %v1742_v34 }
 0xe78   : > { %v1743_v38 = vmul.f32 1.442695, %v1741_v36 }
 0xe79   : > { %3810 = vpow2.f32 %v1745_v37 }
 0xe7a   : > { %3812 = vpow2.f32 %v1743_v38 }
 0xe83   : > { %v3811_v40 = vpop.eup %3810 }
 0xe84   : > { %v3813_v41 = vpop.eup %3812  ;;  %v1750_v43 = vsel %vm574_vm5, %v3811_v40, 0.0 }
 0xe85   : > { %1751 = vadd.xlane.f32.xlu1 %v1750_v43  ;;  %v1747_v39 = vsel %vm574_vm5, %v3813_v41, 0.0 }
 0xe86   : > { %1748 = vadd.xlane.f32.xlu0 %v1747_v39 }
 0xee7   : > { %v1944_v42 = vpop.xlane.xlu1 %1943 }
 0xee8   : > { %v1946_v44 = vsub.f32 %v1938_v28, %v1944_v42  ;;  %v1941_v45 = vpop.xlane.xlu0 %1940 }
 0xee9   : > { %v1945_v50 = vsub.f32 %v1937_v29, %v1941_v45 }
 0xeea   : > { %v1949_v49 = vmul.f32 1.442695, %v1946_v44 }
 0xeeb   : > { %v1947_v51 = vmul.f32 1.442695, %v1945_v50 }
 0xeec   : > { %3814 = vpow2.f32 %v1949_v49 }
 0xeed   : > { %3816 = vpow2.f32 %v1947_v51 }
 0xef6   : > { %v3815_v48 = vpop.eup %3814 }
 0xef7   : > { %v3817_v52 = vpop.eup %3816  ;;  %v1954_v26 = vsel %vm574_vm5, %v3815_v48, 0.0 }
 0xef8   : > { %1955 = vadd.xlane.f32.xlu1 %v1954_v26  ;;  %v1951_v53 = vsel %vm574_vm5, %v3817_v52, 0.0 }
 0xef9   : > { %1952 = vadd.xlane.f32.xlu0 %v1951_v53 }
 0xf09   : > { %3750 = vrot.lane.b32.xlu1 %v4140_v2, %s3864_s28 }
 0xf0d   : > { %3755 = vrot.lane.b32.xlu1 %v4140_v2, %s3868_s15 }
 0xf0f   : > { %3745 = vrot.lane.b32.xlu0 %v4140_v2, %s3863_s27 }
 0xf11   : > { %2050 = vrot.lane.b32.xlu1 %v4151_v10, %s3868_s15 }
 0xf12   : > { %v1752_v57 = vpop.xlane.xlu1 %1751 }
 0xf13   : > { %2048 = vrot.lane.b32.xlu0 %v4153_v12, %s3868_s15  ;;  %v1749_v54 = vpop.xlane.xlu0 %1748 }
 0xf14   : > { %3818 = vrcp.f32 %v1749_v54 }
 0xf15   : > { %3820 = vrcp.f32 %v1752_v57 }
 0xf1e   : > { %v3819_v55 = vpop.eup %3818 }
 0xf1f   : > { %v1755_v56 = vmul.f32 %v3819_v55, %v3813_v41  ;;  %v3821_v7 = vpop.eup %3820 }
 0xf20   : > { %v1756_v13 = vmul.f32 %v3821_v7, %v3811_v40 }
 0xf21   : > { %3419 = vmatprep.mubr.msk.f32.mxu0 %vm574_vm5, %v1755_v56 }
 0xf85   : > { %v1956_v59 = vpop.xlane.xlu1 %1955 }
 0xf86   : > { %v1953_v61 = vpop.xlane.xlu0 %1952 }
 0xf87   : > { %3822 = vrcp.f32 %v1953_v61 }
 0xf88   : > { %3824 = vrcp.f32 %v1956_v59 }
 0xf89   : > { %v3751_v62 = vpop.permute.xlu1 %3750 }
 0xf8a   : > { %v3746_v63 = vpop.permute.xlu0 %3745  ;;  %v3753_v0 = vunpack.i.h.bf16 %v3751_v62  ;;  %v3752_v1 = vunpack.i.l.bf16 %v3751_v62 }
 0xf8b   : > { %v3748_v3 = vunpack.i.h.bf16 %v3746_v63  ;;  %v3747_v4 = vunpack.i.l.bf16 %v3746_v63 }
 0xf8c   : > { %v3613_v8 = vpack.c.bf16 %v3753_v0, %v3752_v1 }
 0xf8d   : > { %v3603_v5 = vpack.c.bf16 %v3748_v3, %v3747_v4  ;;  %v3756_v6 = vpop.permute.xlu1 %3755 }
 0xf8e   : > { %v3758_v9 = vunpack.i.h.bf16 %v3756_v6  ;;  %v3757_v11 = vunpack.i.l.bf16 %v3756_v6  ;;  %v2049_v17 = vpop.permute.xlu0 %2048 }
 0xf8f   : > { %3604 = vmatprep.subr.bf16.mxu0 %v3603_v5 }
 0xf90   : > { %3606 = vmatpush3.bf16.msra.mxu0 %v3603_v5  ;;  %v3617_v23 = vpack.c.bf16 %v3758_v9, %v3757_v11 }
 0xf91   : > { %v3823_v47 = vpop.eup %3822  ;;  %3614 = vmatprep.subr.bf16.mxu0 %v3613_v8  ;;  %v2051_v19 = vpop.permute.xlu1 %2050 }
 0xf92   : > { %v3825_v25 = vpop.eup %3824  ;;  %v1959_v14 = vmul.f32 %v3823_v47, %v3817_v52 }
 0xf93   : > { %3420 = vmatmul.mubr.msk.f32.vlgmr.msra.gmra.mrb[12].mxu0 %vm574_vm5, %v1756_v13  ;;  %v1960_v16 = vmul.f32 %v3825_v25, %v3815_v48 }
 0xf94   : > { %3616 = vmatpush3.bf16.msra.mxu0 %v3613_v8  ;;  %3433 = vmatprep.mubr.msk.f32.mxu0 %vm574_vm5, %v1959_v14 }
 0xf95   : > { %3619 = vmatprep.subr.msk.bf16.mxu0 %vm3990_vm4, %v3617_v23 }
 0xf97   : > { %3434 = vmatmul.mubr.msk.f32.vlgmr.msra.gmra.mrb[14].mxu0 %vm574_vm5, %v1960_v16 }
 0xf98   : > { %3440 = vmatprep.mubr.msk.f32.mxu0 %vm486_vm3, %v2049_v17 }
 0xf9d   : > { %3622 = vmatpush3.bf16.xpose.msk.msra.mxu0 %vm3990_vm4, %v3617_v23 }
 0xfa4   : > { %3441 = vmatmul.mubr.msk.f32.vlgmr.msra.gmra.mrb[16].mxu0 %vm486_vm3, %v2051_v19 }
0x1066   : > { %v4209_v21 = vpop.f32.mrb[12].mxu0 }
0x1067   : > { %v4211_v22 = vpop.f32.mrb[13].mxu0 }
0x106a   : > { %v4213_v24 = vpop.f32.mrb[14].mxu0 }
0x106b   : > { %v4215_v27 = vpop.f32.mrb[15].mxu0 }
0x1077   : > { %v3442_v20 = vpop.f32.mrb[16].mxu0 }
0x1078   : > { %v2140_v18 = vmul.f32 0.35355338, %v3442_v20  ;;  %v2130_v28 = vpop.f32.mrb[17].mxu0 }
0x1079   : > { %v2139_v29 = vmul.f32 0.35355338, %v2130_v28 }
0x107a   : > { %v2142_v31 = vadd.f32 %v2140_v18, %v4170_v46 }
0x107b   : > { %v2141_v32 = vadd.f32 %v2139_v29, %v4175_v15 }
0x107c   : > { %v2146_v33 = vsel %vm574_vm5, %v2142_v31, -inf }
0x107d   : > { %2147 = vmax.xlane.f32.xlu1 %v2146_v33  ;;  %v2143_v34 = vsel %vm574_vm5, %v2141_v32, -inf  ;;  %v2487_v33 = vld [vmem:[%s3931_s8 + $0x88] sm:$0xff] }
0x107e   : > { %2144 = vmax.xlane.f32.xlu0 %v2143_v34  ;;  %v2488_v34 = vld [vmem:[%s3931_s8 + $0x90] sm:$0xff] }
0x108e   : > { %3760 = vrot.lane.b32.xlu1 %v4140_v2, %s3866_s13 }
0x1092   : > { %2252 = vrot.lane.b32.xlu1 %v4153_v12, %s3870_s17 }
0x1096   : > { %2254 = vrot.lane.b32.xlu1 %v4151_v10, %s3870_s17 }
0x110a   : > { %v2148_v35 = vpop.xlane.xlu1 %2147 }
0x110b   : > { %v2150_v36 = vsub.f32 %v2142_v31, %v2148_v35  ;;  %v2145_v37 = vpop.xlane.xlu0 %2144 }
0x110c   : > { %v2149_v38 = vsub.f32 %v2141_v32, %v2145_v37  ;;  %v2486_v32 = vld [vmem:[%s3931_s8 + $0x80] sm:$0xff] }
0x110d   : > { %v2153_v40 = vmul.f32 1.442695, %v2150_v36  ;;  %v3637_v35 = vpack.c.bf16 %v2487_v33, %v2486_v32  ;;  %v3157_v33 = vld [vmem:[%s3936_s11 + $0xa] ss:$0 sm:$0xff] }
0x110e   : > { %v2151_v41 = vmul.f32 1.442695, %v2149_v38  ;;  %v3761_v43 = vpop.permute.xlu1 %3760 }
0x110f   : > { %3826 = vpow2.f32 %v2153_v40  ;;  %v3763_v39 = vunpack.i.h.bf16 %v3761_v43  ;;  %v3762_v42 = vunpack.i.l.bf16 %v3761_v43 }
0x1110   : > { %3828 = vpow2.f32 %v2151_v41 }
0x1111   : > { %v3623_v44 = vpack.c.bf16 %v3763_v39, %v3762_v42 }
0x1112   : > { %v2253_v59 = vpop.permute.xlu1 %2252 }
0x1113   : > { %3624 = vmatprep.subr.bf16.mxu1 %v3623_v44 }
0x1114   : > { %3626 = vmatpush3.bf16.msra.mxu1 %v3623_v44 }
0x1116   : > { %v2255_v61 = vpop.permute.xlu1 %2254 }
0x1119   : > { %v3827_v45 = vpop.eup %3826 }
0x111a   : > { %v2158_v12 = vsel %vm574_vm5, %v3827_v45, 0.0  ;;  %v3829_v50 = vpop.eup %3828 }
0x111b   : > { %2159 = vadd.xlane.f32.xlu0 %v2158_v12  ;;  %v2155_v10 = vsel %vm574_vm5, %v3829_v50, 0.0 }
0x111f   : > { %2156 = vadd.xlane.f32.xlu0 %v2155_v10 }
0x1135   : > { %3765 = vrot.lane.b32.xlu0 %v4140_v2, %s3870_s17 }
0x11a8   : > { %v2160_v49 = vpop.xlane.xlu0 %2159 }
0x11a9   : > { %3830 = vrcp.f32 %v2160_v49 }
0x11ac   : > { %v2157_v51 = vpop.xlane.xlu0 %2156 }
0x11ad   : > { %3832 = vrcp.f32 %v2157_v51 }
0x11b0   : > { %v3766_v48 = vpop.permute.xlu0 %3765 }
0x11b1   : > { %v3768_v52 = vunpack.i.h.bf16 %v3766_v48  ;;  %v3767_v26 = vunpack.i.l.bf16 %v3766_v48  ;;  %v3153_v48 = vld [vmem:[%s3936_s11 + $0x4] ss:$0 sm:$0xff] }
0x11b3   : > { %v3627_v53 = vpack.c.bf16 %v3768_v52, %v3767_v26  ;;  %v3831_v54 = vpop.eup %3830 }
0x11b4   : > { %v2164_v57 = vmul.f32 %v3831_v54, %v3827_v45 }
0x11b5   : > { %3629 = vmatprep.subr.msk.bf16.mxu1 %vm3990_vm4, %v3627_v53 }
0x11b7   : > { %v3833_v55 = vpop.eup %3832 }
0x11b8   : > { %v2163_v56 = vmul.f32 %v3833_v55, %v3829_v50 }
0x11ba   : > { %3447 = vmatprep.mubr.msk.f32.mxu1 %vm574_vm5, %v2163_v56 }
0x11bb   : > { %3448 = vmatmul.mubr.msk.f32.vlgmr.msra.gmra.mrb[16].mxu1 %vm574_vm5, %v2164_v57 }
0x11bc   : > { %3632 = vmatpush3.bf16.xpose.msk.msra.mxu1 %vm3990_vm4, %v3627_v53  ;;  %3454 = vmatprep.mubr.msk.f32.mxu1 %vm486_vm3, %v2253_v59 }
0x11c3   : > { %3455 = vmatmul.mubr.msk.f32.vlgmr.msra.gmra.mrb[18].mxu1 %vm486_vm3, %v2255_v61 }
0x128e   : > { %v3449_v62 = vpop.f32.mrb[16].mxu1 }
0x128f   : > { %v2243_v63 = vpop.f32.mrb[17].mxu1 }
0x1296   : > { %v3456_v0 = vpop.f32.mrb[18].mxu1 }
0x1297   : > { %v2344_v1 = vmul.f32 0.35355338, %v3456_v0  ;;  %v2334_v3 = vpop.f32.mrb[19].mxu1 }
0x1298   : > { %v2343_v4 = vmul.f32 0.35355338, %v2334_v3 }
0x1299   : > { %v2346_v5 = vadd.f32 %v2344_v1, %v4170_v46 }
0x129a   : > { %v2345_v6 = vadd.f32 %v2343_v4, %v4175_v15  ;;  %v2618_v4 = vld [vmem:[%s3931_s8 + $0xa0] sm:$0xff] }
0x129b   : > { %v2350_v7 = vsel %vm574_vm5, %v2346_v5, -inf }
0x129c   : > { %2351 = vmax.xlane.f32.xlu1 %v2350_v7  ;;  %v2347_v30 = vsel %vm574_vm5, %v2345_v6, -inf  ;;  %v2620_v7 = vld [vmem:[%s3931_s8 + $0xb0] sm:$0xff] }
0x129d   : > { %2348 = vmax.xlane.f32.xlu0 %v2347_v30  ;;  %v2621_v30 = vld [vmem:[%s3931_s8 + $0xb8] sm:$0xff] }
0x12ad   : > { %3770 = vrot.lane.b32.xlu1 %v4140_v2, %s3869_s16 }
0x12b1   : > { %2460 = vrot.lane.b32.xlu1 %v4213_v24, %s3872_s19 }
0x12b5   : > { %2466 = vrot.lane.b32.xlu1 %v2243_v63, %s3874_s21 }
0x1329   : > { %v2352_v8 = vpop.xlane.xlu1 %2351 }
0x132a   : > { %v2354_v9 = vsub.f32 %v2346_v5, %v2352_v8  ;;  %v2349_v11 = vpop.xlane.xlu0 %2348  ;;  %v2619_v5 = vld [vmem:[%s3931_s8 + $0xa8] sm:$0xff]  ;;  %v3649_v8 = vpack.c.bf16 %v2621_v30, %v2620_v7 }
0x132b   : > { %v2353_v46 = vsub.f32 %v2345_v6, %v2349_v11  ;;  %v3645_v6 = vpack.c.bf16 %v2619_v5, %v2618_v4  ;;  %v2711_v11 = vld [vmem:[%s3931_s8 + $0xc8] sm:$0xff] }
0x132c   : > { %v2357_v47 = vmul.f32 1.442695, %v2354_v9  ;;  %v2710_v9 = vld [vmem:[%s3931_s8 + $0xc0] sm:$0xff]  ;;  %v3164_v7 = vld [vmem:[%s3936_s11 + $0xb] ss:$0 sm:$0xff] }
0x132d   : > { %v2355_v15 = vmul.f32 1.442695, %v2353_v46  ;;  %v3771_v13 = vpop.permute.xlu1 %3770  ;;  %3646 = vmatprep.subr.bf16.mxu1 %v3645_v6  ;;  %v2712_v46 = vld [vmem:[%s3931_s8 + $0xd0] sm:$0xff] }
0x132e   : > { %v3773_v25 = vunpack.i.h.bf16 %v3771_v13  ;;  %v3772_v14 = vunpack.i.l.bf16 %v3771_v13  ;;  %3648 = vmatpush3.bf16.msra.mxu1 %v3645_v6 }
0x132f   : > { %3834 = vpow2.f32 %v2355_v15  ;;  %3650 = vmatprep.subr.bf16.mxu1 %v3649_v8  ;;  %v2713_v15 = vld [vmem:[%s3931_s8 + $0xd8] sm:$0xff] }
0x1330   : > { %v3633_v23 = vpack.c.bf16 %v3773_v25, %v3772_v14  ;;  %3836 = vpow2.f32 %v2357_v47  ;;  %v3653_v47 = vpack.c.bf16 %v2711_v11, %v2710_v9  ;;  %v3657_v13 = vpack.c.bf16 %v2713_v15, %v2712_v46  ;;  %v2714_v25 = vld [vmem:[%s3931_s8 + $0xe0] sm:$0xff]  ;;  %v2715_v14 = vld [vmem:[%s3931_s8 + $0xe8] sm:$0xff] }
0x1331   : > { %v2461_v41 = vpop.permute.xlu1 %2460  ;;  %v3165_v9 = vld [vmem:[%s3936_s11 + $0xc] ss:$0 sm:$0xff] }
0x1332   : > { %3634 = vmatprep.subr.bf16.mxu0 %v3633_v23  ;;  %v2481_v45 = vsel %vm486_vm3, %v4209_v21, %v2461_v41  ;;  %3652 = vmatpush3.bf16.msra.mxu1 %v3649_v8  ;;  %v3158_v41 = vld [vmem:[%s3936_s11 + $0x5] ss:$0 sm:$0xff] }
0x1333   : > { %3636 = vmatpush3.bf16.msra.mxu0 %v3633_v23  ;;  %v3661_v23 = vpack.c.bf16 %v2715_v14, %v2714_v25  ;;  %v2853_v25 = vld [vmem:[%s4341_s4 + $0x20] sm:$0xff] (!%p3166_p5)  ;;  %v2854_v14 = vld [vmem:[%s4341_s4 + $0x28] sm:$0xff] (!%p3166_p5) }
0x1334   : > { %3638 = vmatprep.subr.bf16.mxu0 %v3637_v35 }
0x1335   : > { %v2467_v39 = vpop.permute.xlu1 %2466 }
0x1339   : > { %v3835_v2 = vpop.eup %3834 }
0x133a   : > { %v2359_v16 = vsel %vm574_vm5, %v3835_v2, 0.0  ;;  %v3837_v17 = vpop.eup %3836 }
0x133b   : > { %2360 = vadd.xlane.f32.xlu0 %v2359_v16  ;;  %v2362_v19 = vsel %vm574_vm5, %v3837_v17, 0.0 }
0x133f   : > { %2363 = vadd.xlane.f32.xlu0 %v2362_v19 }
0x1355   : > { %2458 = vrot.lane.b32.xlu0 %v4215_v27, %s3872_s19  ;;  %v2489_v27 = vld [vmem:[%s3931_s8 + $0x98] sm:$0xff] }
0x1356   : > { %v3641_v36 = vpack.c.bf16 %v2489_v27, %v2488_v34 }
0x1359   : > { %2468 = vrot.lane.b32.xlu0 %v3449_v62, %s3874_s21 }
0x13c8   : > { %v2361_v24 = vpop.xlane.xlu0 %2360 }
0x13c9   : > { %3838 = vrcp.f32 %v2361_v24 }
0x13cc   : > { %v2364_v20 = vpop.xlane.xlu0 %2363 }
0x13cd   : > { %3840 = vrcp.f32 %v2364_v20 }
0x13d0   : > { %v2459_v40 = vpop.permute.xlu0 %2458 }
0x13d1   : > { %v2480_v42 = vsel %vm486_vm3, %v4211_v22, %v2459_v40 }
0x13d2   : > { %v2482_v50 = vsel %vm574_vm5, %v2480_v42, %v2467_v39 }
0x13d3   : > { %v3839_v18 = vpop.eup %3838 }
0x13d4   : > { %v2367_v28 = vmul.f32 %v3839_v18, %v3835_v2  ;;  %v2469_v43 = vpop.permute.xlu0 %2468 }
0x13d5   : > { %v2483_v10 = vsel %vm574_vm5, %v2481_v45, %v2469_v43 }
0x13d6   : > { %3461 = vmatprep.mubr.msk.f32.mxu0 %vm574_vm5, %v2367_v28  ;;  %v3156_v28 = vld [vmem:[%s3936_s11 + $0x9] ss:$0 sm:$0xff] }
0x13d7   : > { %v3841_v29 = vpop.eup %3840 }
0x13d8   : > { %v2368_v31 = vmul.f32 %v3841_v29, %v3837_v17 }
0x13da   : > { %3462 = vmatmul.mubr.msk.f32.vlgmr.msra.gmra.mrb[18].mxu0 %vm574_vm5, %v2368_v31 }
0x13db   : > { %3640 = vmatpush3.bf16.msra.mxu0 %v3637_v35 }
0x13dc   : > { %3642 = vmatprep.subr.bf16.mxu0 %v3641_v36 }
0x13df   : > { %3644 = vmatpush3.bf16.msra.mxu0 %v3641_v36 }
0x13e0   : > { %3654 = vmatprep.subr.bf16.mxu0 %v3653_v47 }
0x14ad   : > { %v3463_v37 = vpop.f32.mrb[18].mxu0 }
0x14ae   : > { %2476 = vrot.lane.b32.xlu0 %v3463_v37, %s3875_s22  ;;  %v2447_v38 = vpop.f32.mrb[19].mxu0  ;;  %v2716_v37 = vld [vmem:[%s3931_s8 + $0xf0] sm:$0xff] }
0x14af   : > { %2474 = vrot.lane.b32.xlu1 %v2447_v38, %s3875_s22  ;;  %v2717_v38 = vld [vmem:[%s3931_s8 + $0xf8] sm:$0xff] }
0x14b0   : > { %v3665_v40 = vpack.c.bf16 %v2717_v38, %v2716_v37 }
0x1520   : > { %v2477_v44 = vpop.permute.xlu0 %2476 }
0x1521   : > { %v2475_v12 = vpop.permute.xlu1 %2474  ;;  %v2485_v51 = vsel %vm1324_vm6, %v2483_v10, %v2477_v44 }
0x1522   : > { %v2484_v49 = vsel %vm1324_vm6, %v2482_v50, %v2475_v12  ;;  %v3161_v50 = vld [vmem:[%s3936_s11 + $0x6] ss:$0 sm:$0xff] }
0x1523   : > { %3472 = vmatprep.mubr.msk.f32.mxu0 %vm396_vm2, %v2484_v49 }
0x1524   : > { %3473 = vmatmul.mubr.msk.f32.vlgmr.msra.gmra.mrb[20].mxu0 %vm396_vm2, %v2485_v51 }
0x1525   : > { %3656 = vmatpush3.bf16.msra.mxu0 %v3653_v47 }
0x1526   : > { %3658 = vmatprep.subr.bf16.mxu0 %v3657_v13 }
0x1529   : > { %3660 = vmatpush3.bf16.msra.mxu0 %v3657_v13 }
0x152a   : > { %3662 = vmatprep.subr.bf16.mxu0 %v3661_v23 }
0x152d   : > { %3664 = vmatpush3.bf16.msra.mxu0 %v3661_v23  ;;  %v2855_v23 = vld [vmem:[%s4341_s4 + $0x30] sm:$0xff] (!%p3166_p5) }
0x152e   : > { %3666 = vmatprep.subr.bf16.mxu0 %v3665_v40 }
0x1531   : > { %3668 = vmatpush3.bf16.msra.mxu0 %v3665_v40 }
0x15f7   : > { %v3474_v52 = vpop.f32.mrb[20].mxu0 }
0x15f8   : > { %v2573_v22 = vadd.f32 %v3474_v52, %v3153_v48  ;;  %v2567_v26 = vpop.f32.mrb[21].mxu0 }
0x15f9   : > { %v2568_v53 = vadd.f32 %v3153_v48, %v2567_v26 }
0x15fa   : > { %v2577_v21 = vadd.f32 %v2573_v22, %v4135_v60 }
0x15fb   : > { %v2576_v54 = vadd.f32 %v2568_v53, %v4131_v58 }
0x15fc   : > { %v2583_v55 = vsel %vm396_vm2, %v2577_v21, 0.0 }
0x15fd   : > { %2584 = vadd.xlane.f32.xlu0 %v2583_v55  ;;  %v2580_v56 = vsel %vm396_vm2, %v2576_v54, 0.0 }
0x15fe   : > { %2581 = vadd.xlane.f32.xlu1 %v2580_v56 }
0x168a   : > { %v2585_v57 = vpop.xlane.xlu0 %2584 }
0x168b   : > { %v2587_v59 = vmul.f32 0.03125, %v2585_v57  ;;  %v2582_v61 = vpop.xlane.xlu1 %2581 }
0x168c   : > { %v2586_v62 = vmul.f32 0.03125, %v2582_v61 }
0x168d   : > { %v2589_v63 = vsub.f32 %v2577_v21, %v2587_v59 }
0x168e   : > { %v2588_v0 = vsub.f32 %v2576_v54, %v2586_v62 }
0x168f   : > { %v2591_v1 = vmul.f32 %v2589_v63, %v2589_v63 }
0x1690   : > { %v2590_v60 = vmul.f32 %v2588_v0, %v2588_v0 }
0x1691   : > { %v2595_v58 = vsel %vm396_vm2, %v2591_v1, 0.0 }
0x1692   : > { %2596 = vadd.xlane.f32.xlu1 %v2595_v58  ;;  %v2592_v3 = vsel %vm396_vm2, %v2590_v60, 0.0 }
0x1693   : > { %2593 = vadd.xlane.f32.xlu0 %v2592_v3 }
0x171f   : > { %v2597_v2 = vpop.xlane.xlu1 %2596 }
0x1720   : > { %v2599_v16 = vmul.f32 0.03125, %v2597_v2  ;;  %v2594_v17 = vpop.xlane.xlu0 %2593  ;;  %v3669_v2 = vpack.c.bf16 (!%p3166_p5), %v2854_v14, %v2853_v25 }
0x1721   : > { %v2598_v19 = vmul.f32 0.03125, %v2594_v17 }
0x1722   : > { %v2601_v24 = vadd.f32 1e-05, %v2599_v16  ;;  %v2856_v16 = vld [vmem:[%s4341_s4 + $0x38] sm:$0xff] (!%p3166_p5)  ;;  %3670 = vmatprep.subr.bf16.mxu0 (!%p3166_p5), %v3669_v2 }
0x1723   : > { %v2600_v20 = vadd.f32 1e-05, %v2598_v19  ;;  %v3673_v17 = vpack.c.bf16 (!%p3166_p5), %v2856_v16, %v2855_v23  ;;  %v2858_v19 = vld [vmem:[%s4341_s4 + $0x48] sm:$0xf] (!%p3166_p5) }
0x1724   : > { %3842 = vrsqrt.f32 %v2601_v24  ;;  %3516 = vmatprep.subr.msk.mxu1 (!%p3166_p5), %vm2958_vm8, %v2858_v19  ;;  %v3167_v24 = vld [vmem:[%s4341_s4 + $0x40] ss:$0 sm:$0xff] (!%p3166_p5) }
0x1725   : > { %3844 = vrsqrt.f32 %v2600_v20 }
0x172e   : > { %v3843_v18 = vpop.eup %3842 }
0x172f   : > { %v3845_v29 = vpop.eup %3844  ;;  %v2605_v31 = vmul.f32 %v3843_v18, %v2589_v63 }
0x1730   : > { %v2604_v32 = vmul.f32 %v3845_v29, %v2588_v0 }
0x1731   : > { %v2611_v34 = vmul.f32 %v3156_v28, %v2605_v31 }
0x1732   : > { %v2610_v35 = vmul.f32 %v3156_v28, %v2604_v32 }
0x1733   : > { %v2617_v36 = vadd.f32 %v3157_v33, %v2611_v34 }
0x1734   : > { %v2616_v27 = vadd.f32 %v3157_v33, %v2610_v35  ;;  %v3170_v33 = vld [vmem:[%s4341_s4 + $0x50] ss:$0 sm:$0xff] (!%p3166_p5) }
0x1736   : > { %3483 = vmatprep.mubr.msk.f32.mxu1 %vm396_vm2, %v2616_v27 }
0x1737   : > { %3484 = vmatmul.mubr.msk.f32.vlgmr.msra.gmra.mrb[20].mxu1 %vm396_vm2, %v2617_v36 }
0x1738   : > { %3517 = vmatpush3.msk.msra.mxu1 (!%p3166_p5), %vm2958_vm8, %v2858_v19 }
0x180a   : > { %v3485_v43 = vpop.f32.mrb[20].mxu1 }
0x180b   : > { %v2705_v39 = vadd.f32 %v3485_v43, %v3158_v41  ;;  %v2699_v42 = vpop.f32.mrb[21].mxu1 }
0x180c   : > { %v2700_v44 = vadd.f32 %v3158_v41, %v2699_v42 }
0x180d   : > { %v2709_v12 = vmax.f32 %v2705_v39, 0.0 }
0x180e   : > { %v2708_v45 = vmax.f32 %v2700_v44, 0.0 }
0x1810   : > { %3502 = vmatprep.mubr.msk.f32.mxu0 %vm2723_vm7, %v2708_v45 }
0x1811   : > { %3503 = vmatmul.mubr.msk.f32.vlgmr.msra.gmra.mrb[22].mxu0 %vm2723_vm7, %v2709_v12 }
0x1812   : > { %3672 = vmatpush3.bf16.msra.mxu0 (!%p3166_p5), %v3669_v2 }
0x1813   : > { %3674 = vmatprep.subr.bf16.mxu0 (!%p3166_p5), %v3673_v17 }
0x1816   : > { %3676 = vmatpush3.bf16.msra.mxu0 (!%p3166_p5), %v3673_v17 }
0x18e4   : > { %v3504_v10 = vpop.f32.mrb[22].mxu0 }
0x18e5   : > { %v2802_v49 = vadd.f32 %v3504_v10, %v3161_v50  ;;  %v2796_v51 = vpop.f32.mrb[23].mxu0 }
0x18e6   : > { %v2797_v48 = vadd.f32 %v3161_v50, %v2796_v51 }
0x18e7   : > { %v2806_v52 = vadd.f32 %v2802_v49, %v2617_v36 }
0x18e8   : > { %v2805_v22 = vadd.f32 %v2797_v48, %v2616_v27 }
0x18e9   : > { %v2812_v26 = vsel %vm396_vm2, %v2806_v52, 0.0 }
0x18ea   : > { %2813 = vadd.xlane.f32.xlu1 %v2812_v26  ;;  %v2809_v53 = vsel %vm396_vm2, %v2805_v22, 0.0 }
0x18eb   : > { %2810 = vadd.xlane.f32.xlu0 %v2809_v53 }
0x1977   : > { %v2814_v21 = vpop.xlane.xlu1 %2813 }
0x1978   : > { %v2816_v54 = vmul.f32 0.03125, %v2814_v21  ;;  %v2811_v55 = vpop.xlane.xlu0 %2810 }
0x1979   : > { %v2815_v56 = vmul.f32 0.03125, %v2811_v55 }
0x197a   : > { %v2818_v57 = vsub.f32 %v2806_v52, %v2816_v54 }
0x197b   : > { %v2817_v59 = vsub.f32 %v2805_v22, %v2815_v56 }
0x197c   : > { %v2820_v61 = vmul.f32 %v2818_v57, %v2818_v57 }
0x197d   : > { %v2819_v62 = vmul.f32 %v2817_v59, %v2817_v59 }
0x197e   : > { %v2824_v63 = vsel %vm396_vm2, %v2820_v61, 0.0 }
0x197f   : > { %2825 = vadd.xlane.f32.xlu1 %v2824_v63  ;;  %v2821_v0 = vsel %vm396_vm2, %v2819_v62, 0.0 }
0x1980   : > { %2822 = vadd.xlane.f32.xlu0 %v2821_v0 }
0x1a0c   : > { %v2826_v1 = vpop.xlane.xlu1 %2825 }
0x1a0d   : > { %v2828_v60 = vmul.f32 0.03125, %v2826_v1  ;;  %v2823_v58 = vpop.xlane.xlu0 %2822 }
0x1a0e   : > { %v2827_v3 = vmul.f32 0.03125, %v2823_v58 }
0x1a0f   : > { %v2830_v4 = vadd.f32 1e-05, %v2828_v60 }
0x1a10   : > { %v2829_v5 = vadd.f32 1e-05, %v2827_v3 }
0x1a11   : > { %3846 = vrsqrt.f32 %v2830_v4 }
0x1a12   : > { %3848 = vrsqrt.f32 %v2829_v5 }
0x1a1b   : > { %v3847_v6 = vpop.eup %3846 }
0x1a1c   : > { %v3849_v30 = vpop.eup %3848  ;;  %v2834_v8 = vmul.f32 %v3847_v6, %v2818_v57 }
0x1a1d   : > { %v2833_v11 = vmul.f32 %v3849_v30, %v2817_v59  ;;  %2852 = sbr.rel (%p3166_p5) target bundleno = 7135 (0x1bdf), region = 56 }
0x1a1e   : > { %v2840_v46 = vmul.f32 %v3164_v7, %v2834_v8 }
0x1a1f   : > { %v2839_v47 = vmul.f32 %v3164_v7, %v2833_v11 }
0x1a20   : > { %v2846_v15 = vadd.f32 %v3165_v9, %v2840_v46 }
0x1a21   : > { %v2845_v13 = vadd.f32 %v3165_v9, %v2839_v47 }
0x1a22   : > { %2848 = vst.msk [vmem:[#allocation2 + $0x8] sm:$0xff] %vm396_vm2, %v2846_v15 }
0x1a23   : > { %2847 = vst.msk [vmem:[#allocation2] sm:$0xff] %vm396_vm2, %v2845_v13  ;;  %3513 = vmatprep.mubr.msk.f32.mxu0 (!%p3166_p5), %vm396_vm2, %v2845_v13 }
0x1a24   : > { %3514 = vmatmul.mubr.msk.f32.vlgmr.msra.gmra.mrb[0].mxu0 %vm396_vm2, %v2846_v15 }
0x1af7   : > { %v3515_v20 = vpop.f32.mrb[0].mxu0 }
0x1af8   : > { %v2942_v18 = vadd.f32 %v3515_v20, %v3167_v24  ;;  %v2936_v28 = vpop.f32.mrb[1].mxu0 }
0x1af9   : > { %v2937_v29 = vadd.f32 %v3167_v24, %v2936_v28 }
0x1afb   : > { %3850 = vtanh.f32 %v2937_v29 }
0x1afc   : > { %3852 = vtanh.f32 %v2942_v18 }
0x1b05   : > { %v3851_v31 = vpop.eup %3850 }
0x1b06   : > { %v3853_v32 = vpop.eup %3852  ;;  %3518 = vmatprep.mubr.msk.f32.mxu1 %vm2951_vm9, %v3851_v31 }
0x1b07   : > { %3519 = vmatmul.mubr.msk.f32.vlgmr.msra.gmra.mrb[0].mxu1 %vm2951_vm9, %v3853_v32 }
0x1bda   : > { %v3520_v34 = vpop.f32.mrb[0].mxu1 }
0x1bdb   : > { %v3034_v35 = vadd.f32 %v3520_v34, %v3170_v33  ;;  %v3028_v27 = vpop.f32.mrb[1].mxu1 }
0x1bdc   : > { %v3029_v36 = vadd.f32 %v3170_v33, %v3028_v27 }
0x1bdd   : > { %3038 = vst.msk [vmem:[%s4344_s7 + $0x8] sm:$0xff] %vm2951_vm9, %v3034_v35 }
0x1bde   : > { %3037 = vst.msk [vmem:[%s4344_s7] sm:$0xff] %vm2951_vm9, %v3029_v36 }
0x1bdf PF: > { %s17_s24 = sadd.s32 1, %s3860_s24  }
0x1be0   : > { %p14_p6 = scmp.ge.s32.totalorder %s17_s24, 4  }
0x1be2   :  { %16 = sbr.rel (!%p14_p6) target bundleno = 1 (0x1), region = 85 }

</bundles_post_ra>
